<compile_context>
chip_gen: v7x
topology: tpu7x:2x2x1
jax: 0.10.0
libtpu: 0.0.40
codegen_flags: <defaults>
</compile_context>

<pallas_src>
import functools

import jax
import jax.numpy as jnp
from jax.experimental import pallas as pl
from jax.experimental.pallas import tpu as pltpu

LANE = 128            # TPU vreg lane width; channel/class dims padded to this
NEG_INF = -1e30       # bias for padded class slots (exp underflows to 0)
C1, C2 = 10, 20       # real conv output channels
HIDDEN, N_CLASSES = 50, 10

_CompilerParams = getattr(pltpu, "CompilerParams", None) or getattr(
    pltpu, "TPUCompilerParams", None
)


def _mosaic(dimension_semantics):
    return _CompilerParams(dimension_semantics=tuple(dimension_semantics))


def _round_up(x, m):
    return ((x + m - 1) // m) * m


# ----------------------------------------------------------------------------
# Pallas kernels
# ----------------------------------------------------------------------------
def _matmul_bias_kernel(x_ref, w_ref, b_ref, o_ref, *, apply_relu):
    # x: (TM, K) bf16, w: (K, Np) bf16, b: (1, Np) f32 -> o: (TM, Np)
    y = jnp.dot(x_ref[...], w_ref[...], preferred_element_type=jnp.float32)
    y = y + b_ref[...]
    if apply_relu:
        y = jnp.maximum(y, 0.0)
    o_ref[...] = y.astype(o_ref.dtype)


def matmul_bias(x, w, b, *, apply_relu=False, out_dtype=jnp.bfloat16, tile_m=512):
    """x:(M,K), w:(K,Np) bf16, b:(1,Np) f32 -> (M,Np) out_dtype. Np % 128 == 0."""
    M, K = x.shape
    Kw, Np = w.shape
    assert K == Kw and Np % LANE == 0
    tm = min(tile_m, _round_up(M, 8))
    Mp = _round_up(M, tm)
    xb = x.astype(jnp.bfloat16)
    if Mp != M:
        xb = jnp.pad(xb, ((0, Mp - M), (0, 0)))
    out = pl.pallas_call(
        functools.partial(_matmul_bias_kernel, apply_relu=apply_relu),
        out_shape=jax.ShapeDtypeStruct((Mp, Np), out_dtype),
        grid=(Mp // tm,),
        in_specs=[
            pl.BlockSpec((tm, K), lambda i: (i, 0)),
            pl.BlockSpec((K, Np), lambda i: (0, 0)),   # weight resident
            pl.BlockSpec((1, Np), lambda i: (0, 0)),
        ],
        out_specs=pl.BlockSpec((tm, Np), lambda i: (i, 0)),
        compiler_params=_mosaic(("parallel",)),
    )(xb, w, b)
    return out[:M]


def _maxpool2x2_kernel(x_ref, o_ref):
    # x: (TR, 2, PW, 2C).  axis 1 = vertical pool pair; the lane dim packs the
    # horizontal pool pair as [left C | right C].
    c = o_ref.shape[-1]
    m = jnp.max(x_ref[...], axis=1)                    # (TR, PW, 2C)
    o_ref[...] = jnp.maximum(m[..., :c], m[..., c:])   # (TR, PW, C)


def maxpool2x2(y, *, tile_r=8):
    """y: (N, H, W, C), C % 128 == 0 -> (N, H//2, W//2, C). Same dtype."""
    N, H, W, C = y.shape
    assert C % LANE == 0 and H % 2 == 0 and W % 2 == 0
    PH, PW = H // 2, W // 2
    R = N * PH
    yr = y.reshape(R, 2, PW, 2 * C)        # contiguous reshape, no transpose
    Rp = _round_up(R, tile_r)
    if Rp != R:
        yr = jnp.pad(yr, ((0, Rp - R), (0, 0), (0, 0), (0, 0)))
    out = pl.pallas_call(
        _maxpool2x2_kernel,
        out_shape=jax.ShapeDtypeStruct((Rp, PW, C), y.dtype),
        grid=(Rp // tile_r,),
        in_specs=[pl.BlockSpec((tile_r, 2, PW, 2 * C), lambda i: (i, 0, 0, 0))],
        out_specs=pl.BlockSpec((tile_r, PW, C), lambda i: (i, 0, 0)),
        compiler_params=_mosaic(("parallel",)),
    )(yr)
    return out[:R].reshape(N, PH, PW, C)


def _fc_head_kernel(x_ref, w1_ref, b1_ref, w2_ref, b2_ref, o_ref):
    # fc1 + ReLU + fc2 + log_softmax, all in one kernel (f32 epilogue).
    h = jnp.dot(x_ref[...], w1_ref[...], preferred_element_type=jnp.float32)
    h = jnp.maximum(h + b1_ref[...], 0.0)
    logits = jnp.dot(h.astype(w2_ref.dtype), w2_ref[...],
                     preferred_element_type=jnp.float32) + b2_ref[...]
    m = jnp.max(logits, axis=-1, keepdims=True)
    s = logits - m
    lse = jnp.log(jnp.sum(jnp.exp(s), axis=-1, keepdims=True))
    o_ref[...] = s - lse


def fc_head(x, w1, b1, w2, b2, *, n_classes, tile_b=512):
    N, K = x.shape
    tb = min(tile_b, _round_up(N, 8))
    Np = _round_up(N, tb)
    xb = x.astype(jnp.bfloat16)
    if Np != N:
        xb = jnp.pad(xb, ((0, Np - N), (0, 0)))
    out = pl.pallas_call(
        _fc_head_kernel,
        out_shape=jax.ShapeDtypeStruct((Np, LANE), jnp.float32),
        grid=(Np // tb,),
        in_specs=[
            pl.BlockSpec((tb, K), lambda i: (i, 0)),
            pl.BlockSpec((K, LANE), lambda i: (0, 0)),
            pl.BlockSpec((1, LANE), lambda i: (0, 0)),
            pl.BlockSpec((LANE, LANE), lambda i: (0, 0)),
            pl.BlockSpec((1, LANE), lambda i: (0, 0)),
        ],
        out_specs=pl.BlockSpec((tb, LANE), lambda i: (i, 0)),
        compiler_params=_mosaic(("parallel",)),
    )(xb, w1, b1, w2, b2)
    return out[:N, :n_classes]


# ----------------------------------------------------------------------------
# Glue: NHWC im2col (K flattening order = (kh, kw, c), matching prepped weights)
# ----------------------------------------------------------------------------
def im2col_nhwc(x, k, k_pad):
    N, H, W, C = x.shape
    OH, OW = H - k + 1, W - k + 1
    patches = jnp.stack(
        [x[:, i:i + OH, j:j + OW, :] for i in range(k) for j in range(k)],
        axis=3,
    )                                                  # (N, OH, OW, k*k, C)
    patches = patches.reshape(N * OH * OW, k * k * C)
    if k_pad > k * k * C:
        patches = jnp.pad(patches, ((0, 0), (0, k_pad - k * k * C)))
    return patches, OH, OW


# ----------------------------------------------------------------------------
# Parameters: PyTorch-layout init + one-time prep (pad / transpose / cast)
# ----------------------------------------------------------------------------
def init_params(key):
    ks = jax.random.split(key, 8)
    scale = 0.1
    return {
        "conv1_w": scale * jax.random.normal(ks[0], (C1, 1, 5, 5), jnp.float32),
        "conv1_b": scale * jax.random.normal(ks[1], (C1,), jnp.float32),
        "conv2_w": scale * jax.random.normal(ks[2], (C2, C1, 5, 5), jnp.float32),
        "conv2_b": scale * jax.random.normal(ks[3], (C2,), jnp.float32),
        "fc1_w": scale * jax.random.normal(ks[4], (HIDDEN, 320), jnp.float32),
        "fc1_b": scale * jax.random.normal(ks[5], (HIDDEN,), jnp.float32),
        "fc2_w": scale * jax.random.normal(ks[6], (N_CLASSES, HIDDEN), jnp.float32),
        "fc2_b": scale * jax.random.normal(ks[7], (N_CLASSES,), jnp.float32),
    }


def _prep_conv(w, b):
    # (OC, C, k, k) PyTorch layout -> (round_up(k*k*C, 8), 128) bf16 matmul
    # weight matching im2col's (kh, kw, c) flattening; bias -> (1, 128) f32.
    OC, C, k, _ = w.shape
    kk = k * k * C
    k_pad = _round_up(kk, 8)
    wm = jnp.transpose(w, (2, 3, 1, 0)).reshape(kk, OC)
    wm = jnp.pad(wm, ((0, k_pad - kk), (0, LANE - OC)))
    bm = jnp.pad(b, (0, LANE - OC)).reshape(1, LANE)
    return wm.astype(jnp.bfloat16), bm.astype(jnp.float32)


def prepare_params(p):
    out = {}
    out["conv1_w"], out["conv1_b"] = _prep_conv(p["conv1_w"], p["conv1_b"])
    out["conv2_w"], out["conv2_b"] = _prep_conv(p["conv2_w"], p["conv2_b"])

    # fc1: PyTorch flattens (N, C=20, 4, 4) -> 320.  Our activation is the
    # channel-padded NHWC tensor flattened to (N, 4*4*128) = (N, 2048), so
    # scatter fc1_w's columns into that layout (zero rows for padded channels).
    w1 = p["fc1_w"].reshape(HIDDEN, C2, 4, 4)          # (out, c, h, w)
    w1 = jnp.transpose(w1, (2, 3, 1, 0))               # (h, w, c, out)
    w1 = jnp.pad(w1, ((0, 0), (0, 0), (0, LANE - C2), (0, LANE - HIDDEN)))
    out["fc1_w"] = w1.reshape(4 * 4 * LANE, LANE).astype(jnp.bfloat16)
    out["fc1_b"] = (
        jnp.pad(p["fc1_b"], (0, LANE - HIDDEN)).reshape(1, LANE).astype(jnp.float32)
    )

    # fc2: padded class slots get a huge negative bias so in-kernel
    # log_softmax over 128 lanes equals log_softmax over the 10 real classes.
    w2 = jnp.pad(p["fc2_w"].T, ((0, LANE - HIDDEN), (0, LANE - N_CLASSES)))
    out["fc2_w"] = w2.astype(jnp.bfloat16)
    b2 = jnp.full((1, LANE), NEG_INF, jnp.float32)
    out["fc2_b"] = b2.at[0, :N_CLASSES].set(p["fc2_b"].astype(jnp.float32))
    return out


# ----------------------------------------------------------------------------
# Forward
# ----------------------------------------------------------------------------
@jax.jit
def mnist_cnn_forward(prepared, x_nchw):
    N = x_nchw.shape[0]
    x = jnp.transpose(x_nchw, (0, 2, 3, 1)).astype(jnp.bfloat16)  # NHWC

    # conv1 (+fused ReLU; relu∘maxpool == maxpool∘relu) -> 2x2 max-pool
    p1, oh1, ow1 = im2col_nhwc(x, 5, prepared["conv1_w"].shape[0])
    y = matmul_bias(p1, prepared["conv1_w"], prepared["conv1_b"], apply_relu=True)
    y = maxpool2x2(y.reshape(N, oh1, ow1, LANE))                  # (N,12,12,128)

    # conv2 (+fused ReLU; Dropout2d is identity in eval) -> 2x2 max-pool
    y = y[..., :C1]                                               # drop pad chans
    p2, oh2, ow2 = im2col_nhwc(y, 5, prepared["conv2_w"].shape[0])
    y = matmul_bias(p2, prepared["conv2_w"], prepared["conv2_b"], apply_relu=True)
    y = maxpool2x2(y.reshape(N, oh2, ow2, LANE))                  # (N,4,4,128)

    # fc1 + ReLU + (eval dropout = identity) + fc2 + log_softmax, fused
    xf = y.reshape(N, 4 * 4 * LANE)
    return fc_head(xf, prepared["fc1_w"], prepared["fc1_b"],
                   prepared["fc2_w"], prepared["fc2_b"], n_classes=N_CLASSES)


# ----------------------------------------------------------------------------
# Pure-JAX f32 reference (for a sanity check of layout / ordering)
# ----------------------------------------------------------------------------
def reference_forward(params, x):
    def conv(v, w, b):
        y = jax.lax.conv_general_dilated(
            v, w, window_strides=(1, 1), padding="VALID",
            dimension_numbers=("NCHW", "OIHW", "NCHW"))
        return y + b[None, :, None, None]

    def pool2(v):
        n, c, h, w = v.shape
        return jnp.max(v.reshape(n, c, h // 2, 2, w // 2, 2), axis=(3, 5))

    y = jax.nn.relu(pool2(conv(x, params["conv1_w"], params["conv1_b"])))
    y = jax.nn.relu(pool2(conv(y, params["conv2_w"], params["conv2_b"])))
    y = y.reshape(y.shape[0], -1)
    y = jax.nn.relu(y @ params["fc1_w"].T + params["fc1_b"])
    y = y @ params["fc2_w"].T + params["fc2_b"]
    return jax.nn.log_softmax(y, axis=-1)


if __name__ == "__main__":
    key = jax.random.PRNGKey(0)
    pkey, xkey = jax.random.split(key)
    params = init_params(pkey)
    prepared = prepare_params(params)            # one-time prep, outside forward
    # MNIST-shaped input (the architecture requires 28x28x1), small batch.
    x = jax.random.normal(xkey, (2, 1, 28, 28), jnp.float32)

    out = mnist_cnn_forward(prepared, x)
    out = jax.block_until_ready(out)

    assert out.shape == (2, N_CLASSES)
    assert bool(jnp.all(jnp.isfinite(out)))
    # log_softmax rows should exponentiate-sum to 1
    assert bool(jnp.allclose(jnp.sum(jnp.exp(out), axis=1), 1.0, atol=1e-3))
    # match the pure-f32 reference (bf16 matmul operands -> loose tolerance)
    ref = reference_forward(params, x)
    assert float(jnp.max(jnp.abs(out - ref))) < 0.2

    print("KERNEL_OK")
</pallas_src>

<mosaic_0001>
module attributes {stable_mosaic.version = 11 : i64} {
  func.func @_matmul_bias_kernel(%arg0: i32, %arg1: memref<512x32xbf16, #tpu.memory_space<vmem>>, %arg2: memref<32x128xbf16, #tpu.memory_space<vmem>>, %arg3: memref<1x128xf32, #tpu.memory_space<vmem>>, %arg4: memref<512x128xbf16, #tpu.memory_space<vmem>>) attributes {dimension_semantics = [#tpu.dimension_semantics<parallel>], iteration_bounds = array<i64: 3>, scalar_prefetch = 0 : i64, scratch_operands = 0 : i64, tpu.core_type = #tpu.core_type<tc>, window_params = [{transform_indices = @transform_0, window_bounds = array<i64: 512, 32>}, {pipeline_mode = #tpu.pipeline_mode<synchronous>, transform_indices = @transform_1, window_bounds = array<i64: 32, 128>}, {pipeline_mode = #tpu.pipeline_mode<synchronous>, transform_indices = @transform_2, window_bounds = array<i64: 1, 128>}, {transform_indices = @transform_3, window_bounds = array<i64: 512, 128>}]} {
    %c0 = arith.constant 0 : index
    %c0_0 = arith.constant 0 : index
    %0 = vector.load %arg1[%c0, %c0_0] : memref<512x32xbf16, #tpu.memory_space<vmem>>, vector<512x32xbf16>
    %c0_1 = arith.constant 0 : index
    %c0_2 = arith.constant 0 : index
    %1 = vector.load %arg2[%c0_1, %c0_2] : memref<32x128xbf16, #tpu.memory_space<vmem>>, vector<32x128xbf16>
    %cst = arith.constant dense<0.000000e+00> : vector<512x128xf32>
    %2 = tpu.matmul %0, %1, %cst {dimension_numbers = #tpu.dot_dimension_numbers<[1], [0], [0], [1], [0, 0, 1, 1], [], []>} : vector<512x32xbf16>, vector<32x128xbf16>, vector<512x128xf32> -> vector<512x128xf32>
    %c0_3 = arith.constant 0 : index
    %c0_4 = arith.constant 0 : index
    %3 = vector.load %arg3[%c0_3, %c0_4] : memref<1x128xf32, #tpu.memory_space<vmem>>, vector<1x128xf32>
    %4 = vector.broadcast %3 : vector<1x128xf32> to vector<512x128xf32>
    %5 = arith.addf %2, %4 : vector<512x128xf32>
    %cst_5 = arith.constant 0.000000e+00 : f32
    %6 = vector.broadcast %cst_5 : f32 to vector<512x128xf32>
    %7 = arith.maximumf %5, %6 : vector<512x128xf32>
    %8 = arith.truncf %7 : vector<512x128xf32> to vector<512x128xbf16>
    %c0_6 = arith.constant 0 : index
    %c0_7 = arith.constant 0 : index
    %9 = vector.load %arg4[%c0_6, %c0_7] : memref<512x128xbf16, #tpu.memory_space<vmem>>, vector<512x128xbf16>
    tpu.vector_store %arg4[%c0_6, %c0_7], %8 {strides = array<i32>} : memref<512x128xbf16, #tpu.memory_space<vmem>>, vector<512x128xbf16>,
    return
  }
  func.func @transform_0(%arg0: i32) -> (i32, i32) {
    %c0_i32 = arith.constant 0 : i32
    %c0_i32_0 = arith.constant 0 : i32
    return %arg0, %c0_i32 : i32, i32
  }
  func.func @transform_1(%arg0: i32) -> (i32, i32) {
    %c0_i32 = arith.constant 0 : i32
    %c0_i32_0 = arith.constant 0 : i32
    %c0_i32_1 = arith.constant 0 : i32
    return %c0_i32, %c0_i32_0 : i32, i32
  }
  func.func @transform_2(%arg0: i32) -> (i32, i32) {
    %c0_i32 = arith.constant 0 : i32
    %c0_i32_0 = arith.constant 0 : i32
    %c0_i32_1 = arith.constant 0 : i32
    return %c0_i32, %c0_i32_0 : i32, i32
  }
  func.func @transform_3(%arg0: i32) -> (i32, i32) {
    %c0_i32 = arith.constant 0 : i32
    %c0_i32_0 = arith.constant 0 : i32
    return %arg0, %c0_i32 : i32, i32
  }
}

module attributes {stable_mosaic.version = 11 : i64} {
  func.func @_maxpool2x2_kernel(%arg0: i32, %arg1: memref<8x2x12x256xbf16, #tpu.memory_space<vmem>>, %arg2: memref<8x12x128xbf16, #tpu.memory_space<vmem>>) attributes {dimension_semantics = [#tpu.dimension_semantics<parallel>], iteration_bounds = array<i64: 3>, scalar_prefetch = 0 : i64, scratch_operands = 0 : i64, tpu.core_type = #tpu.core_type<tc>, window_params = [{transform_indices = @transform_0, window_bounds = array<i64: 8, 2, 12, 256>}, {transform_indices = @transform_1, window_bounds = array<i64: 8, 12, 128>}]} {
    %c0 = arith.constant 0 : index
    %c0_0 = arith.constant 0 : index
    %c0_1 = arith.constant 0 : index
    %c0_2 = arith.constant 0 : index
    %0 = vector.load %arg1[%c0, %c0_0, %c0_1, %c0_2] : memref<8x2x12x256xbf16, #tpu.memory_space<vmem>>, vector<8x2x12x256xbf16>
    %cst = arith.constant dense<0xFF80> : vector<8x12x256xbf16>
    %1 = vector.multi_reduction <maximumf>, %0, %cst [1] : vector<8x2x12x256xbf16> to vector<8x12x256xbf16>
    %2 = vector.extract_strided_slice %1 {offsets = [0, 0, 0], sizes = [8, 12, 128], strides = [1, 1, 1]} : vector<8x12x256xbf16> to vector<8x12x128xbf16>
    %3 = vector.extract_strided_slice %1 {offsets = [0, 0, 128], sizes = [8, 12, 128], strides = [1, 1, 1]} : vector<8x12x256xbf16> to vector<8x12x128xbf16>
    %4 = arith.maximumf %2, %3 : vector<8x12x128xbf16>
    %c0_3 = arith.constant 0 : index
    %c0_4 = arith.constant 0 : index
    %c0_5 = arith.constant 0 : index
    %5 = vector.load %arg2[%c0_3, %c0_4, %c0_5] : memref<8x12x128xbf16, #tpu.memory_space<vmem>>, vector<8x12x128xbf16>
    tpu.vector_store %arg2[%c0_3, %c0_4, %c0_5], %4 {strides = array<i32>} : memref<8x12x128xbf16, #tpu.memory_space<vmem>>, vector<8x12x128xbf16>,
    return
  }
  func.func @transform_0(%arg0: i32) -> (i32, i32, i32, i32) {
    %c0_i32 = arith.constant 0 : i32
    %c0_i32_0 = arith.constant 0 : i32
    %c0_i32_1 = arith.constant 0 : i32
    %c0_i32_2 = arith.constant 0 : i32
    return %arg0, %c0_i32, %c0_i32_0, %c0_i32_1 : i32, i32, i32, i32
  }
  func.func @transform_1(%arg0: i32) -> (i32, i32, i32) {
    %c0_i32 = arith.constant 0 : i32
    %c0_i32_0 = arith.constant 0 : i32
    %c0_i32_1 = arith.constant 0 : i32
    return %arg0, %c0_i32, %c0_i32_0 : i32, i32, i32
  }
}

module attributes {stable_mosaic.version = 11 : i64} {
  func.func @_matmul_bias_kernel(%arg0: i32, %arg1: memref<128x256xbf16, #tpu.memory_space<vmem>>, %arg2: memref<256x128xbf16, #tpu.memory_space<vmem>>, %arg3: memref<1x128xf32, #tpu.memory_space<vmem>>, %arg4: memref<128x128xbf16, #tpu.memory_space<vmem>>) attributes {dimension_semantics = [#tpu.dimension_semantics<parallel>], iteration_bounds = array<i64: 1>, scalar_prefetch = 0 : i64, scratch_operands = 0 : i64, tpu.core_type = #tpu.core_type<tc>, window_params = [{transform_indices = @transform_0, window_bounds = array<i64: 128, 256>}, {pipeline_mode = #tpu.pipeline_mode<synchronous>, transform_indices = @transform_1, window_bounds = array<i64: 256, 128>}, {pipeline_mode = #tpu.pipeline_mode<synchronous>, transform_indices = @transform_2, window_bounds = array<i64: 1, 128>}, {transform_indices = @transform_3, window_bounds = array<i64: 128, 128>}]} {
    %c0 = arith.constant 0 : index
    %c0_0 = arith.constant 0 : index
    %0 = vector.load %arg1[%c0, %c0_0] : memref<128x256xbf16, #tpu.memory_space<vmem>>, vector<128x256xbf16>
    %c0_1 = arith.constant 0 : index
    %c0_2 = arith.constant 0 : index
    %1 = vector.load %arg2[%c0_1, %c0_2] : memref<256x128xbf16, #tpu.memory_space<vmem>>, vector<256x128xbf16>
    %cst = arith.constant dense<0.000000e+00> : vector<128x128xf32>
    %2 = tpu.matmul %0, %1, %cst {dimension_numbers = #tpu.dot_dimension_numbers<[1], [0], [0], [1], [0, 0, 1, 1], [], []>} : vector<128x256xbf16>, vector<256x128xbf16>, vector<128x128xf32> -> vector<128x128xf32>
    %c0_3 = arith.constant 0 : index
    %c0_4 = arith.constant 0 : index
    %3 = vector.load %arg3[%c0_3, %c0_4] : memref<1x128xf32, #tpu.memory_space<vmem>>, vector<1x128xf32>
    %4 = vector.broadcast %3 : vector<1x128xf32> to vector<128x128xf32>
    %5 = arith.addf %2, %4 : vector<128x128xf32>
    %cst_5 = arith.constant 0.000000e+00 : f32
    %6 = vector.broadcast %cst_5 : f32 to vector<128x128xf32>
    %7 = arith.maximumf %5, %6 : vector<128x128xf32>
    %8 = arith.truncf %7 : vector<128x128xf32> to vector<128x128xbf16>
    %c0_6 = arith.constant 0 : index
    %c0_7 = arith.constant 0 : index
    %9 = vector.load %arg4[%c0_6, %c0_7] : memref<128x128xbf16, #tpu.memory_space<vmem>>, vector<128x128xbf16>
    tpu.vector_store %arg4[%c0_6, %c0_7], %8 {strides = array<i32>} : memref<128x128xbf16, #tpu.memory_space<vmem>>, vector<128x128xbf16>,
    return
  }
  func.func @transform_0(%arg0: i32) -> (i32, i32) {
    %c0_i32 = arith.constant 0 : i32
    %c0_i32_0 = arith.constant 0 : i32
    return %arg0, %c0_i32 : i32, i32
  }
  func.func @transform_1(%arg0: i32) -> (i32, i32) {
    %c0_i32 = arith.constant 0 : i32
    %c0_i32_0 = arith.constant 0 : i32
    %c0_i32_1 = arith.constant 0 : i32
    return %c0_i32, %c0_i32_0 : i32, i32
  }
  func.func @transform_2(%arg0: i32) -> (i32, i32) {
    %c0_i32 = arith.constant 0 : i32
    %c0_i32_0 = arith.constant 0 : i32
    %c0_i32_1 = arith.constant 0 : i32
    return %c0_i32, %c0_i32_0 : i32, i32
  }
  func.func @transform_3(%arg0: i32) -> (i32, i32) {
    %c0_i32 = arith.constant 0 : i32
    %c0_i32_0 = arith.constant 0 : i32
    return %arg0, %c0_i32 : i32, i32
  }
}

module attributes {stable_mosaic.version = 11 : i64} {
  func.func @_maxpool2x2_kernel(%arg0: i32, %arg1: memref<8x2x4x256xbf16, #tpu.memory_space<vmem>>, %arg2: memref<8x4x128xbf16, #tpu.memory_space<vmem>>) attributes {dimension_semantics = [#tpu.dimension_semantics<parallel>], iteration_bounds = array<i64: 1>, scalar_prefetch = 0 : i64, scratch_operands = 0 : i64, tpu.core_type = #tpu.core_type<tc>, window_params = [{transform_indices = @transform_0, window_bounds = array<i64: 8, 2, 4, 256>}, {transform_indices = @transform_1, window_bounds = array<i64: 8, 4, 128>}]} {
    %c0 = arith.constant 0 : index
    %c0_0 = arith.constant 0 : index
    %c0_1 = arith.constant 0 : index
    %c0_2 = arith.constant 0 : index
    %0 = vector.load %arg1[%c0, %c0_0, %c0_1, %c0_2] : memref<8x2x4x256xbf16, #tpu.memory_space<vmem>>, vector<8x2x4x256xbf16>
    %cst = arith.constant dense<0xFF80> : vector<8x4x256xbf16>
    %1 = vector.multi_reduction <maximumf>, %0, %cst [1] : vector<8x2x4x256xbf16> to vector<8x4x256xbf16>
    %2 = vector.extract_strided_slice %1 {offsets = [0, 0, 0], sizes = [8, 4, 128], strides = [1, 1, 1]} : vector<8x4x256xbf16> to vector<8x4x128xbf16>
    %3 = vector.extract_strided_slice %1 {offsets = [0, 0, 128], sizes = [8, 4, 128], strides = [1, 1, 1]} : vector<8x4x256xbf16> to vector<8x4x128xbf16>
    %4 = arith.maximumf %2, %3 : vector<8x4x128xbf16>
    %c0_3 = arith.constant 0 : index
    %c0_4 = arith.constant 0 : index
    %c0_5 = arith.constant 0 : index
    %5 = vector.load %arg2[%c0_3, %c0_4, %c0_5] : memref<8x4x128xbf16, #tpu.memory_space<vmem>>, vector<8x4x128xbf16>
    tpu.vector_store %arg2[%c0_3, %c0_4, %c0_5], %4 {strides = array<i32>} : memref<8x4x128xbf16, #tpu.memory_space<vmem>>, vector<8x4x128xbf16>,
    return
  }
  func.func @transform_0(%arg0: i32) -> (i32, i32, i32, i32) {
    %c0_i32 = arith.constant 0 : i32
    %c0_i32_0 = arith.constant 0 : i32
    %c0_i32_1 = arith.constant 0 : i32
    %c0_i32_2 = arith.constant 0 : i32
    return %arg0, %c0_i32, %c0_i32_0, %c0_i32_1 : i32, i32, i32, i32
  }
  func.func @transform_1(%arg0: i32) -> (i32, i32, i32) {
    %c0_i32 = arith.constant 0 : i32
    %c0_i32_0 = arith.constant 0 : i32
    %c0_i32_1 = arith.constant 0 : i32
    return %arg0, %c0_i32, %c0_i32_0 : i32, i32, i32
  }
}

module attributes {stable_mosaic.version = 11 : i64} {
  func.func @_fc_head_kernel(%arg0: i32, %arg1: memref<8x2048xbf16, #tpu.memory_space<vmem>>, %arg2: memref<2048x128xbf16, #tpu.memory_space<vmem>>, %arg3: memref<1x128xf32, #tpu.memory_space<vmem>>, %arg4: memref<128x128xbf16, #tpu.memory_space<vmem>>, %arg5: memref<1x128xf32, #tpu.memory_space<vmem>>, %arg6: memref<8x128xf32, #tpu.memory_space<vmem>>) attributes {dimension_semantics = [#tpu.dimension_semantics<parallel>], iteration_bounds = array<i64: 1>, scalar_prefetch = 0 : i64, scratch_operands = 0 : i64, tpu.core_type = #tpu.core_type<tc>, window_params = [{transform_indices = @transform_0, window_bounds = array<i64: 8, 2048>}, {pipeline_mode = #tpu.pipeline_mode<synchronous>, transform_indices = @transform_1, window_bounds = array<i64: 2048, 128>}, {pipeline_mode = #tpu.pipeline_mode<synchronous>, transform_indices = @transform_2, window_bounds = array<i64: 1, 128>}, {pipeline_mode = #tpu.pipeline_mode<synchronous>, transform_indices = @transform_3, window_bounds = array<i64: 128, 128>}, {pipeline_mode = #tpu.pipeline_mode<synchronous>, transform_indices = @transform_4, window_bounds = array<i64: 1, 128>}, {transform_indices = @transform_5, window_bounds = array<i64: 8, 128>}]} {
    %c0 = arith.constant 0 : index
    %c0_0 = arith.constant 0 : index
    %0 = vector.load %arg1[%c0, %c0_0] : memref<8x2048xbf16, #tpu.memory_space<vmem>>, vector<8x2048xbf16>
    %c0_1 = arith.constant 0 : index
    %c0_2 = arith.constant 0 : index
    %1 = vector.load %arg2[%c0_1, %c0_2] : memref<2048x128xbf16, #tpu.memory_space<vmem>>, vector<2048x128xbf16>
    %cst = arith.constant dense<0.000000e+00> : vector<8x128xf32>
    %2 = tpu.matmul %0, %1, %cst {dimension_numbers = #tpu.dot_dimension_numbers<[1], [0], [0], [1], [0, 0, 1, 1], [], []>} : vector<8x2048xbf16>, vector<2048x128xbf16>, vector<8x128xf32> -> vector<8x128xf32>
    %c0_3 = arith.constant 0 : index
    %c0_4 = arith.constant 0 : index
    %3 = vector.load %arg3[%c0_3, %c0_4] : memref<1x128xf32, #tpu.memory_space<vmem>>, vector<1x128xf32>
    %4 = vector.broadcast %3 : vector<1x128xf32> to vector<8x128xf32>
    %5 = arith.addf %2, %4 : vector<8x128xf32>
    %cst_5 = arith.constant 0.000000e+00 : f32
    %6 = vector.broadcast %cst_5 : f32 to vector<8x128xf32>
    %7 = arith.maximumf %5, %6 : vector<8x128xf32>
    %8 = arith.truncf %7 : vector<8x128xf32> to vector<8x128xbf16>
    %c0_6 = arith.constant 0 : index
    %c0_7 = arith.constant 0 : index
    %9 = vector.load %arg4[%c0_6, %c0_7] : memref<128x128xbf16, #tpu.memory_space<vmem>>, vector<128x128xbf16>
    %cst_8 = arith.constant dense<0.000000e+00> : vector<8x128xf32>
    %10 = tpu.matmul %8, %9, %cst_8 {dimension_numbers = #tpu.dot_dimension_numbers<[1], [0], [0], [1], [0, 0, 1, 1], [], []>} : vector<8x128xbf16>, vector<128x128xbf16>, vector<8x128xf32> -> vector<8x128xf32>
    %c0_9 = arith.constant 0 : index
    %c0_10 = arith.constant 0 : index
    %11 = vector.load %arg5[%c0_9, %c0_10] : memref<1x128xf32, #tpu.memory_space<vmem>>, vector<1x128xf32>
    %12 = vector.broadcast %11 : vector<1x128xf32> to vector<8x128xf32>
    %13 = arith.addf %10, %12 : vector<8x128xf32>
    %cst_11 = arith.constant dense<0xFF800000> : vector<8xf32>
    %14 = vector.multi_reduction <maximumf>, %13, %cst_11 [1] : vector<8x128xf32> to vector<8xf32>
    %15 = vector.shape_cast %14 : vector<8xf32> to vector<8x1xf32>
    %16 = vector.broadcast %15 : vector<8x1xf32> to vector<8x128xf32>
    %17 = arith.subf %13, %16 : vector<8x128xf32>
    %18 = math.exp %17 : vector<8x128xf32>
    %cst_12 = arith.constant dense<0.000000e+00> : vector<8xf32>
    %19 = vector.multi_reduction <add>, %18, %cst_12 [1] : vector<8x128xf32> to vector<8xf32>
    %20 = vector.shape_cast %19 : vector<8xf32> to vector<8x1xf32>
    %21 = math.log %20 : vector<8x1xf32>
    %22 = vector.broadcast %21 : vector<8x1xf32> to vector<8x128xf32>
    %23 = arith.subf %17, %22 : vector<8x128xf32>
    %c0_13 = arith.constant 0 : index
    %c0_14 = arith.constant 0 : index
    %24 = vector.load %arg6[%c0_13, %c0_14] : memref<8x128xf32, #tpu.memory_space<vmem>>, vector<8x128xf32>
    tpu.vector_store %arg6[%c0_13, %c0_14], %23 {strides = array<i32>} : memref<8x128xf32, #tpu.memory_space<vmem>>, vector<8x128xf32>,
    return
  }
  func.func @transform_0(%arg0: i32) -> (i32, i32) {
    %c0_i32 = arith.constant 0 : i32
    %c0_i32_0 = arith.constant 0 : i32
    return %arg0, %c0_i32 : i32, i32
  }
  func.func @transform_1(%arg0: i32) -> (i32, i32) {
    %c0_i32 = arith.constant 0 : i32
    %c0_i32_0 = arith.constant 0 : i32
    %c0_i32_1 = arith.constant 0 : i32
    return %c0_i32, %c0_i32_0 : i32, i32
  }
  func.func @transform_2(%arg0: i32) -> (i32, i32) {
    %c0_i32 = arith.constant 0 : i32
    %c0_i32_0 = arith.constant 0 : i32
    %c0_i32_1 = arith.constant 0 : i32
    return %c0_i32, %c0_i32_0 : i32, i32
  }
  func.func @transform_3(%arg0: i32) -> (i32, i32) {
    %c0_i32 = arith.constant 0 : i32
    %c0_i32_0 = arith.constant 0 : i32
    %c0_i32_1 = arith.constant 0 : i32
    return %c0_i32, %c0_i32_0 : i32, i32
  }
  func.func @transform_4(%arg0: i32) -> (i32, i32) {
    %c0_i32 = arith.constant 0 : i32
    %c0_i32_0 = arith.constant 0 : i32
    %c0_i32_1 = arith.constant 0 : i32
    return %c0_i32, %c0_i32_0 : i32, i32
  }
  func.func @transform_5(%arg0: i32) -> (i32, i32) {
    %c0_i32 = arith.constant 0 : i32
    %c0_i32_0 = arith.constant 0 : i32
    return %arg0, %c0_i32 : i32, i32
  }
}

</mosaic_0001>

<bundles_post_ra>
// kernel: mnist_cnn_forward.6
= control target key start
LH: loop header
LB: loop body
LE: loop exit
PB: predicated region body
PF: predicated region fallthrough
CT: control target
= control target key end

     0   :  { %s405_s6 = smov 0   ;;  %s510_s0 = inlined_call_operand.vmem [shape: bf16[24,2,12,256], index: 0, kind: input, shape index: {}]   ;;  %s511_s1 = inlined_call_operand.vmem [shape: bf16[24,12,128], index: 1, kind: output, shape index: {}]  }
   0x1 LB: > { %s364_s7 = sadd.s32 4294967295, %s393_s6   ;;  %p368_p0 = scmp.ge.s32.totalorder %s393_s6, 1  ;;  %s393_s6 = sphi %s405_s6, %s11_s6  }
   0x2   : > { %p89_p1 = scmp.lt.s32.totalorder %s393_s6, 4 }
   0x4   : > { %p90_p2 = pnand %p368_p0, %p89_p1 }
   0x5   : > { %s369_s8 = sshll.u32 (!%p90_p2), %s364_s7, 3  ;;  %vm159_vm0 = vcmask (!%p90_p2), 1041408   ;;  %vm160_vm1 = vcmask (!%p90_p2), 1045508  }
   0x6   : > { %93 = sbr.rel (%p90_p2) target bundleno = 43 (0x2b), region = 24  ;;  %p112_p3 = scmp.lt.s32.totalorder (!%p90_p2), %s369_s8, 23  ;;  %vm413_vm2 = vmor (!%p90_p2), %vm160_vm1, %vm159_vm0 }
   0xd   : > { %s515_s8 = smov (!%p112_p3, %s369_s8), 23 }
   0xe   : > { %s377_s9 = sshll.u32 %s515_s8, 5  ;;  %s378_s13 = sshll.u32 %s515_s8, 3 }
   0xf   : > { %s420_s12 = scalar_lea.vmem %s510_s0, %s377_s9  ;;  %s442_s16 = scalar_lea.vmem %s511_s1, %s378_s13 }
  0x10   : > { %v126_v1 = vld [vmem:[%s420_s12] sm:$0xff]  ;;  %v128_v2 = vld [vmem:[%s420_s12 + $0x10] sm:$0xff]  ;;  %v127_v3 = vld [vmem:[%s420_s12 + $0x8] sm:$0x33] }
  0x11   : > { %v158_v4 = vmax.bf16 %v128_v2, %v126_v1  ;;  %v129_v5 = vld [vmem:[%s420_s12 + $0x18] sm:$0x33]  ;;  %v164_v6 = vsel %vm413_vm2, %v127_v3, 4286644096  ;;  %v130_v7 = vld [vmem:[%s420_s12 + $0x20] sm:$0xff]  ;;  %v132_v8 = vld [vmem:[%s420_s12 + $0x30] sm:$0xff] }
  0x12   : > { %v167_v9 = vsel %vm413_vm2, %v129_v5, 4286644096  ;;  %v170_v10 = vmax.bf16 %v132_v8, %v130_v7  ;;  %v131_v11 = vld [vmem:[%s420_s12 + $0x28] sm:$0x33]  ;;  %v133_v12 = vld [vmem:[%s420_s12 + $0x38] sm:$0x33] }
  0x13   : > { %v242_v13 = vrot.slane %v158_v4, 4  ;;  %v169_v14 = vmax.bf16 %v167_v9, %v164_v6  ;;  %v172_v15 = vsel %vm413_vm2, %v131_v11, 4286644096  ;;  %v175_v16 = vsel %vm413_vm2, %v133_v12, 4286644096  ;;  %v134_v17 = vld [vmem:[%s420_s12 + $0x40] sm:$0xff] }
  0x14   : > { %v244_v18 = vrot.slane %v170_v10, 4  ;;  %v177_v19 = vmax.bf16 %v175_v16, %v172_v15  ;;  %v136_v20 = vld [vmem:[%s420_s12 + $0x50] sm:$0xff]  ;;  %v135_v21 = vld [vmem:[%s420_s12 + $0x48] sm:$0x33]  ;;  %v137_v22 = vld [vmem:[%s420_s12 + $0x58] sm:$0x33] }
  0x15   : > { %v274_v23 = vmax.bf16 %v242_v13, %v158_v4  ;;  %v243_v24 = vrot.slane %v169_v14, 4  ;;  %v178_v25 = vmax.bf16 %v136_v20, %v134_v17  ;;  %v180_v26 = vsel %vm413_vm2, %v135_v21, 4286644096  ;;  %v138_v27 = vld [vmem:[%s420_s12 + $0x60] sm:$0xff]  ;;  %v140_v28 = vld [vmem:[%s420_s12 + $0x70] sm:$0xff] }
  0x16   : > { %v142_v29 = vld [vmem:[%s420_s12 + $0x80] sm:$0xff]  ;;  %v276_v30 = vmax.bf16 %v244_v18, %v170_v10  ;;  %v245_v31 = vrot.slane %v177_v19, 4  ;;  %v183_v32 = vsel %vm413_vm2, %v137_v22, 4286644096  ;;  %v186_v33 = vmax.bf16 %v140_v28, %v138_v27  ;;  %v139_v34 = vld [vmem:[%s420_s12 + $0x68] sm:$0x33] }
  0x17   : > { %v144_v35 = vld [vmem:[%s420_s12 + $0x90] sm:$0xff]  ;;  %290 = vst [vmem:[%s442_s16] sm:$0xf] %v274_v23  ;;  %v275_v36 = vmax.bf16 %v243_v24, %v169_v14  ;;  %v246_v37 = vrot.slane %v178_v25, 4  ;;  %v185_v38 = vmax.bf16 %v183_v32, %v180_v26  ;;  %v141_v39 = vld [vmem:[%s420_s12 + $0x78] sm:$0x33]  ;;  %v146_v41 = vld [vmem:[%s420_s12 + $0xa0] sm:$0xff] }
  0x18   : > { %v188_v40 = vsel %vm413_vm2, %v139_v34, 4286644096  ;;  %292 = vst [vmem:[%s442_s16 + $0x8] sm:$0xf] %v276_v30  ;;  %v277_v42 = vmax.bf16 %v245_v31, %v177_v19  ;;  %v248_v43 = vrot.slane %v186_v33, 4  ;;  %v194_v45 = vmax.bf16 %v144_v35, %v142_v29  ;;  %v148_v47 = vld [vmem:[%s420_s12 + $0xb0] sm:$0xff] }
  0x19   : > { %v191_v44 = vsel %vm413_vm2, %v141_v39, 4286644096  ;;  %v143_v46 = vld [vmem:[%s420_s12 + $0x88] sm:$0x33]  ;;  %291 = vst [vmem:[%s442_s16 + $0x4] sm:$0x3] %v275_v36  ;;  %v278_v48 = vmax.bf16 %v246_v37, %v178_v25  ;;  %v202_v57 = vmax.bf16 %v148_v47, %v146_v41 }
  0x1a   : > { %v247_v49 = vrot.slane %v185_v38, 4  ;;  %v193_v50 = vmax.bf16 %v191_v44, %v188_v40  ;;  %v145_v51 = vld [vmem:[%s420_s12 + $0x98] sm:$0x33]  ;;  %v196_v52 = vsel %vm413_vm2, %v143_v46, 4286644096  ;;  %v150_v53 = vld [vmem:[%s420_s12 + $0xc0] sm:$0xff]  ;;  %v280_v54 = vmax.bf16 %v248_v43, %v186_v33 }
  0x1b   : > { %293 = vst [vmem:[%s442_s16 + $0xc] sm:$0x3] %v277_v42  ;;  %v250_v55 = vrot.slane %v194_v45, 4  ;;  %v199_v56 = vsel %vm413_vm2, %v145_v51, 4286644096  ;;  %v152_v59 = vld [vmem:[%s420_s12 + $0xd0] sm:$0xff] }
  0x1c   : > { %v147_v58 = vld [vmem:[%s420_s12 + $0xa8] sm:$0x33]  ;;  %294 = vst [vmem:[%s442_s16 + $0x10] sm:$0xf] %v278_v48  ;;  %v279_v60 = vmax.bf16 %v247_v49, %v185_v38  ;;  %v249_v61 = vrot.slane %v193_v50, 4  ;;  %v201_v62 = vmax.bf16 %v199_v56, %v196_v52  ;;  %v154_v2 = vld [vmem:[%s420_s12 + $0xe0] sm:$0xff]  ;;  %v210_v6 = vmax.bf16 %v152_v59, %v150_v53 }
  0x1d   : > { %v149_v63 = vld [vmem:[%s420_s12 + $0xb8] sm:$0x33]  ;;  %v204_v1 = vsel %vm413_vm2, %v147_v58, 4286644096  ;;  %296 = vst [vmem:[%s442_s16 + $0x18] sm:$0xf] %v280_v54  ;;  %v282_v3 = vmax.bf16 %v250_v55, %v194_v45 }
  0x1e   : > { %v252_v4 = vrot.slane %v202_v57, 4  ;;  %v207_v5 = vsel %vm413_vm2, %v149_v63, 4286644096  ;;  %v151_v7 = vld [vmem:[%s420_s12 + $0xc8] sm:$0x33]  ;;  %v156_v8 = vld [vmem:[%s420_s12 + $0xf0] sm:$0xff]  ;;  %v281_v9 = vmax.bf16 %v249_v61, %v193_v50 }
  0x1f   : > { %295 = vst [vmem:[%s442_s16 + $0x14] sm:$0x3] %v279_v60  ;;  %v251_v10 = vrot.slane %v201_v62, 4  ;;  %v209_v11 = vmax.bf16 %v207_v5, %v204_v1  ;;  %v153_v12 = vld [vmem:[%s420_s12 + $0xd8] sm:$0x33]  ;;  %v254_v15 = vrot.slane %v210_v6, 4  ;;  %v218_v17 = vmax.bf16 %v156_v8, %v154_v2 }
  0x20   : > { %v212_v13 = vsel %vm413_vm2, %v151_v7, 4286644096  ;;  %298 = vst [vmem:[%s442_s16 + $0x20] sm:$0xf] %v282_v3  ;;  %v284_v14 = vmax.bf16 %v252_v4, %v202_v57  ;;  %v215_v16 = vsel %vm413_vm2, %v153_v12, 4286644096 }
  0x21   : > { %v155_v18 = vld [vmem:[%s420_s12 + $0xe8] sm:$0x33]  ;;  %297 = vst [vmem:[%s442_s16 + $0x1c] sm:$0x3] %v281_v9  ;;  %v283_v19 = vmax.bf16 %v251_v10, %v201_v62  ;;  %v253_v20 = vrot.slane %v209_v11, 4  ;;  %v217_v21 = vmax.bf16 %v215_v16, %v212_v13  ;;  %v286_v24 = vmax.bf16 %v254_v15, %v210_v6 }
  0x22   : > { %v157_v22 = vld [vmem:[%s420_s12 + $0xf8] sm:$0x33]  ;;  %v220_v23 = vsel %vm413_vm2, %v155_v18, 4286644096  ;;  %300 = vst [vmem:[%s442_s16 + $0x28] sm:$0xf] %v284_v14 }
  0x23   : > { %v256_v25 = vrot.slane %v218_v17, 4  ;;  %v223_v26 = vsel %vm413_vm2, %v157_v22, 4286644096  ;;  %299 = vst [vmem:[%s442_s16 + $0x24] sm:$0x3] %v283_v19  ;;  %v285_v27 = vmax.bf16 %v253_v20, %v209_v11  ;;  %v255_v28 = vrot.slane %v217_v21, 4 }
  0x24   : > { %v225_v29 = vmax.bf16 %v223_v26, %v220_v23  ;;  %302 = vst [vmem:[%s442_s16 + $0x30] sm:$0xf] %v286_v24 }
  0x25   : > { %v288_v30 = vmax.bf16 %v256_v25, %v218_v17  ;;  %301 = vst [vmem:[%s442_s16 + $0x2c] sm:$0x3] %v285_v27  ;;  %v287_v31 = vmax.bf16 %v255_v28, %v217_v21 }
  0x26   : > { %v257_v32 = vrot.slane %v225_v29, 4 }
  0x27   : > { %304 = vst [vmem:[%s442_s16 + $0x38] sm:$0xf] %v288_v30  ;;  %303 = vst [vmem:[%s442_s16 + $0x34] sm:$0x3] %v287_v31 }
  0x28   : > { %v289_v33 = vmax.bf16 %v257_v32, %v225_v29 }
  0x2a   : > { %305 = vst [vmem:[%s442_s16 + $0x3c] sm:$0x3] %v289_v33 }
  0x2b PF: > { %s11_s6 = sadd.s32 1, %s393_s6  }
  0x2c   : > { %p8_p4 = scmp.ge.s32.totalorder %s11_s6, 5  }
  0x2e   :  { %10 = sbr.rel (!%p8_p4) target bundleno = 1 (0x1), region = 54 }

// kernel: mnist_cnn_forward.5
= control target key start
LH: loop header
LB: loop body
LE: loop exit
PB: predicated region body
PF: predicated region fallthrough
CT: control target
= control target key end

     0   :  { %s1821_s12 = smov 0   ;;  %s2020_s0 = inlined_call_operand.vmem [shape: bf16[1536,32], index: 0, kind: input, shape index: {}]   ;;  %s2021_s1 = inlined_call_operand.vmem [shape: bf16[32,128], index: 1, kind: input, shape index: {}]   ;;  %s2022_s2 = inlined_call_operand.vmem [shape: f32[1,128], index: 2, kind: input, shape index: {}]   ;;  %s2023_s3 = inlined_call_operand.vmem [shape: bf16[1536,128], index: 3, kind: output, shape index: {}]  }
   0x1 LB: > { %s1248_s13 = sadd.s32 4294967295, %s1799_s12   ;;  %p1252_p0 = scmp.ge.s32.totalorder %s1799_s12, 1  ;;  %s1799_s12 = sphi %s1821_s12, %s13_s12  }
   0x2   : > { %p138_p1 = scmp.lt.s32.totalorder %s1799_s12, 4 }
   0x4   : > { %p139_p2 = pnand %p1252_p0, %p138_p1 }
   0x5   : > { %v1759_v0 = vld [vmem:[%s2021_s1] sm:$0xff] (!%p139_p2)   ;;  %s1253_s16 = sshll.u32 (!%p139_p2), %s1248_s13, 6  ;;  %v1760_v1 = vld [vmem:[%s2021_s1 + $0x8] sm:$0xff] (!%p139_p2)   ;;  %vm422_vm0 = vcmask (!%p139_p2), 261120  }
   0x6   : > { %142 = sbr.rel (%p139_p2) target bundleno = 297 (0x129), region = 32  ;;  %p163_p3 = scmp.lt.s32.totalorder (!%p139_p2), %s1253_s16, 191  ;;  %1679 = vmatprep.subr.bf16.mxu0 (!%p139_p2), %v1759_v0  ;;  %1747 = vmatprep.subr.bf16.mxu1 (!%p139_p2), %v1759_v0  ;;  %v1912_v34 = vld [vmem:[%s2022_s2] ss:$0 sm:$0xff] (!%p139_p2) }
   0x7   : > { %1680 = vmatpush3.bf16.msra.mxu0 (!%p139_p2), %v1759_v0  ;;  %1749 = vmatpush3.bf16.msra.mxu1 (!%p139_p2), %v1759_v0 }
   0x8   : > { %1681 = vmatprep.subr.bf16.mxu0 (!%p139_p2), %v1760_v1  ;;  %1748 = vmatprep.subr.bf16.mxu1 (!%p139_p2), %v1760_v1 }
   0xb   : > { %1682 = vmatpush3.bf16.msra.mxu0 (!%p139_p2), %v1760_v1  ;;  %1750 = vmatpush3.bf16.msra.mxu1 (!%p139_p2), %v1760_v1 }
   0xd   : > { %s2025_s16 = smov (!%p163_p3, %s1253_s16), 191 }
   0xe   : > { %s1254_s19 = sshll.u32 %s2025_s16, 2 }
   0xf   : > { %s1843_s22 = scalar_lea.vmem %s2020_s0, %s1254_s19  ;;  %s1927_s27 = scalar_lea.vmem %s2023_s3, %s1254_s19 }
  0x10   : > { %v1761_v2 = vld [vmem:[%s1843_s22] sm:$0xff]   ;;  %v1763_v4 = vld [vmem:[%s1843_s22 + $0x8] sm:$0xff]   ;;  %v1765_v6 = vld [vmem:[%s1843_s22 + $0x10] sm:$0xff]  }
  0x11   : > { %v1762_v3 = vld [vmem:[%s1843_s22 + $0x80] sm:$0xff]   ;;  %1683 = vmatprep.mubr.msk.bf16.mxu0 %vm422_vm0, %v1761_v2  ;;  %v1764_v5 = vld [vmem:[%s1843_s22 + $0x88] sm:$0xff]   ;;  %v1766_v7 = vld [vmem:[%s1843_s22 + $0x90] sm:$0xff]  }
  0x12   : > { %1715 = vmatprep.mubr.msk.bf16.mxu1 %vm422_vm0, %v1762_v3  ;;  %1684 = vmatmul.mubr.msk.bf16.vlgmr.msra.gmra.mrb[0].mxu0 %vm422_vm0, %v1763_v4  ;;  %v1767_v8 = vld [vmem:[%s1843_s22 + $0x18] sm:$0xff]   ;;  %v1769_v10 = vld [vmem:[%s1843_s22 + $0x20] sm:$0xff]   ;;  %v1771_v12 = vld [vmem:[%s1843_s22 + $0x28] sm:$0xff]  }
  0x13   : > { %1716 = vmatmul.mubr.msk.bf16.vlgmr.msra.gmra.mrb[0].mxu1 %vm422_vm0, %v1764_v5  ;;  %1687 = vmatprep.mubr.msk.bf16.mxu0 %vm422_vm0, %v1765_v6  ;;  %v1768_v9 = vld [vmem:[%s1843_s22 + $0x98] sm:$0xff]   ;;  %v1770_v11 = vld [vmem:[%s1843_s22 + $0xa0] sm:$0xff]   ;;  %v1772_v13 = vld [vmem:[%s1843_s22 + $0xa8] sm:$0xff]  }
  0x14   : > { %1719 = vmatprep.mubr.msk.bf16.mxu1 %vm422_vm0, %v1766_v7  ;;  %v1773_v14 = vld [vmem:[%s1843_s22 + $0x30] sm:$0xff]   ;;  %v1775_v16 = vld [vmem:[%s1843_s22 + $0x38] sm:$0xff]   ;;  %v1777_v18 = vld [vmem:[%s1843_s22 + $0x40] sm:$0xff]  }
  0x15   : > { %v1774_v15 = vld [vmem:[%s1843_s22 + $0xb0] sm:$0xff]   ;;  %v1776_v17 = vld [vmem:[%s1843_s22 + $0xb8] sm:$0xff]   ;;  %v1778_v19 = vld [vmem:[%s1843_s22 + $0xc0] sm:$0xff]  }
  0x16   : > { %v1779_v20 = vld [vmem:[%s1843_s22 + $0x48] sm:$0xff]   ;;  %v1781_v22 = vld [vmem:[%s1843_s22 + $0x50] sm:$0xff]   ;;  %v1783_v24 = vld [vmem:[%s1843_s22 + $0x58] sm:$0xff]  }
  0x17   : > { %v1780_v21 = vld [vmem:[%s1843_s22 + $0xc8] sm:$0xff]   ;;  %v1782_v23 = vld [vmem:[%s1843_s22 + $0xd0] sm:$0xff]   ;;  %v1784_v25 = vld [vmem:[%s1843_s22 + $0xd8] sm:$0xff]  }
  0x18   : > { %v1785_v26 = vld [vmem:[%s1843_s22 + $0x60] sm:$0xff]   ;;  %v1787_v28 = vld [vmem:[%s1843_s22 + $0x68] sm:$0xff]   ;;  %v1789_v30 = vld [vmem:[%s1843_s22 + $0x70] sm:$0xff]  }
  0x19   : > { %v1786_v27 = vld [vmem:[%s1843_s22 + $0xe0] sm:$0xff]   ;;  %v1788_v29 = vld [vmem:[%s1843_s22 + $0xe8] sm:$0xff]   ;;  %v1790_v31 = vld [vmem:[%s1843_s22 + $0xf0] sm:$0xff]  }
  0x1a   : > { %1688 = vmatmul.mubr.msk.bf16.gmra.mrb[4].mxu0 %vm422_vm0, %v1767_v8  ;;  %v1791_v32 = vld [vmem:[%s1843_s22 + $0x78] sm:$0xff]  }
  0x1b   : > { %1720 = vmatmul.mubr.msk.bf16.gmra.mrb[4].mxu1 %vm422_vm0, %v1768_v9  ;;  %1691 = vmatprep.mubr.msk.bf16.mxu0 %vm422_vm0, %v1769_v10  ;;  %v1792_v33 = vld [vmem:[%s1843_s22 + $0xf8] sm:$0xff]  }
  0x1c   : > { %1723 = vmatprep.mubr.msk.bf16.mxu1 %vm422_vm0, %v1770_v11 }
  0x22   : > { %1692 = vmatmul.mubr.msk.bf16.gmra.mrb[8].mxu0 %vm422_vm0, %v1771_v12 }
  0x23   : > { %1724 = vmatmul.mubr.msk.bf16.gmra.mrb[8].mxu1 %vm422_vm0, %v1772_v13  ;;  %1695 = vmatprep.mubr.msk.bf16.mxu0 %vm422_vm0, %v1773_v14 }
  0x24   : > { %1727 = vmatprep.mubr.msk.bf16.mxu1 %vm422_vm0, %v1774_v15 }
  0x2a   : > { %1696 = vmatmul.mubr.msk.bf16.gmra.mrb[12].mxu0 %vm422_vm0, %v1775_v16 }
  0x2b   : > { %1728 = vmatmul.mubr.msk.bf16.gmra.mrb[12].mxu1 %vm422_vm0, %v1776_v17  ;;  %1699 = vmatprep.mubr.msk.bf16.mxu0 %vm422_vm0, %v1777_v18 }
  0x2c   : > { %1731 = vmatprep.mubr.msk.bf16.mxu1 %vm422_vm0, %v1778_v19 }
  0x32   : > { %1700 = vmatmul.mubr.msk.bf16.gmra.mrb[16].mxu0 %vm422_vm0, %v1779_v20 }
  0x33   : > { %1732 = vmatmul.mubr.msk.bf16.gmra.mrb[16].mxu1 %vm422_vm0, %v1780_v21  ;;  %1703 = vmatprep.mubr.msk.bf16.mxu0 %vm422_vm0, %v1781_v22 }
  0x34   : > { %1735 = vmatprep.mubr.msk.bf16.mxu1 %vm422_vm0, %v1782_v23 }
  0x3a   : > { %1704 = vmatmul.mubr.msk.bf16.gmra.mrb[20].mxu0 %vm422_vm0, %v1783_v24 }
  0x3b   : > { %1736 = vmatmul.mubr.msk.bf16.gmra.mrb[20].mxu1 %vm422_vm0, %v1784_v25  ;;  %1707 = vmatprep.mubr.msk.bf16.mxu0 %vm422_vm0, %v1785_v26 }
  0x3c   : > { %1739 = vmatprep.mubr.msk.bf16.mxu1 %vm422_vm0, %v1786_v27 }
  0x42   : > { %1708 = vmatmul.mubr.msk.bf16.gmra.mrb[24].mxu0 %vm422_vm0, %v1787_v28 }
  0x43   : > { %1740 = vmatmul.mubr.msk.bf16.gmra.mrb[24].mxu1 %vm422_vm0, %v1788_v29  ;;  %1711 = vmatprep.mubr.msk.bf16.mxu0 %vm422_vm0, %v1789_v30 }
  0x44   : > { %1743 = vmatprep.mubr.msk.bf16.mxu1 %vm422_vm0, %v1790_v31 }
  0x4a   : > { %1712 = vmatmul.mubr.msk.bf16.gmra.mrb[28].mxu0 %vm422_vm0, %v1791_v32 }
  0x4b   : > { %1744 = vmatmul.mubr.msk.bf16.gmra.mrb[28].mxu1 %vm422_vm0, %v1792_v33 }
  0xe5   : > { %v1685_v35 = vpop.f32.mrb[0].mxu0 }
  0xe6   : > { %v562_v36 = vadd.f32 %v1685_v35, %v1912_v34  ;;  %v1717_v37 = vpop.f32.mrb[0].mxu1  ;;  %v553_v38 = vpop.f32.mrb[1].mxu0 }
  0xe7   : > { %v690_v39 = vadd.f32 %v1717_v37, %v1912_v34  ;;  %v554_v40 = vadd.f32 %v1912_v34, %v553_v38  ;;  %v681_v41 = vpop.f32.mrb[1].mxu1  ;;  %v1686_v42 = vpop.f32.mrb[2].mxu0 }
  0xe8   : > { %v682_v43 = vadd.f32 %v1912_v34, %v681_v41  ;;  %v565_v44 = vadd.f32 %v1686_v42, %v1912_v34  ;;  %v1718_v45 = vpop.f32.mrb[2].mxu1  ;;  %v556_v46 = vpop.f32.mrb[3].mxu0  ;;  %v810_v50 = vmax.f32 %v562_v36, 0.0 }
  0xe9   : > { %v693_v47 = vadd.f32 %v1718_v45, %v1912_v34  ;;  %v557_v48 = vadd.f32 %v1912_v34, %v556_v46  ;;  %v684_v49 = vpop.f32.mrb[3].mxu1  ;;  %v842_v53 = vmax.f32 %v690_v39, 0.0  ;;  %v808_v54 = vmax.f32 %v554_v40, 0.0 }
  0xea   : > { %v811_v51 = vmax.f32 %v565_v44, 0.0  ;;  %v685_v52 = vadd.f32 %v1912_v34, %v684_v49  ;;  %v840_v57 = vmax.f32 %v682_v43, 0.0 }
  0xeb   : > { %v843_v55 = vmax.f32 %v693_v47, 0.0  ;;  %v809_v56 = vmax.f32 %v557_v48, 0.0 }
  0xec   : > { %v1462_v58 = vpack.c.bf16 %v811_v51, %v810_v50  ;;  %v841_v59 = vmax.f32 %v685_v52, 0.0 }
  0xed   : > { %v1542_v60 = vpack.c.bf16 %v843_v55, %v842_v53  ;;  %v1457_v61 = vpack.c.bf16 %v809_v56, %v808_v54  ;;  %v1689_v62 = vpop.f32.mrb[4].mxu0 }
  0xee   : > { %1614 = vst [vmem:[%s1927_s27 + $0x8] sm:$0xff] %v1462_v58   ;;  %v1537_v63 = vpack.c.bf16 %v841_v59, %v840_v57  ;;  %v578_v0 = vadd.f32 %v1689_v62, %v1912_v34  ;;  %v1721_v1 = vpop.f32.mrb[4].mxu1  ;;  %v569_v2 = vpop.f32.mrb[5].mxu0 }
  0xef   : > { %1630 = vst [vmem:[%s1927_s27 + $0x88] sm:$0xff] %v1542_v60   ;;  %1458 = vst [vmem:[%s1927_s27] sm:$0xff] %v1457_v61   ;;  %v706_v3 = vadd.f32 %v1721_v1, %v1912_v34  ;;  %v570_v4 = vadd.f32 %v1912_v34, %v569_v2  ;;  %v697_v5 = vpop.f32.mrb[5].mxu1  ;;  %v1690_v6 = vpop.f32.mrb[6].mxu0 }
  0xf0   : > { %1629 = vst [vmem:[%s1927_s27 + $0x80] sm:$0xff] %v1537_v63   ;;  %v698_v7 = vadd.f32 %v1912_v34, %v697_v5  ;;  %v581_v8 = vadd.f32 %v1690_v6, %v1912_v34  ;;  %v1722_v9 = vpop.f32.mrb[6].mxu1  ;;  %v572_v10 = vpop.f32.mrb[7].mxu0  ;;  %v814_v14 = vmax.f32 %v578_v0, 0.0 }
  0xf1   : > { %v709_v11 = vadd.f32 %v1722_v9, %v1912_v34  ;;  %v573_v12 = vadd.f32 %v1912_v34, %v572_v10  ;;  %v700_v13 = vpop.f32.mrb[7].mxu1  ;;  %v846_v17 = vmax.f32 %v706_v3, 0.0  ;;  %v812_v18 = vmax.f32 %v570_v4, 0.0 }
  0xf2   : > { %v815_v15 = vmax.f32 %v581_v8, 0.0  ;;  %v701_v16 = vadd.f32 %v1912_v34, %v700_v13  ;;  %v844_v21 = vmax.f32 %v698_v7, 0.0 }
  0xf3   : > { %v847_v19 = vmax.f32 %v709_v11, 0.0  ;;  %v813_v20 = vmax.f32 %v573_v12, 0.0 }
  0xf4   : > { %v1472_v22 = vpack.c.bf16 %v815_v15, %v814_v14  ;;  %v845_v23 = vmax.f32 %v701_v16, 0.0 }
  0xf5   : > { %v1552_v24 = vpack.c.bf16 %v847_v19, %v846_v17  ;;  %v1467_v25 = vpack.c.bf16 %v813_v20, %v812_v18  ;;  %v1693_v26 = vpop.f32.mrb[8].mxu0 }
  0xf6   : > { %1616 = vst [vmem:[%s1927_s27 + $0x18] sm:$0xff] %v1472_v22   ;;  %v1547_v27 = vpack.c.bf16 %v845_v23, %v844_v21  ;;  %v594_v28 = vadd.f32 %v1693_v26, %v1912_v34  ;;  %v1725_v29 = vpop.f32.mrb[8].mxu1  ;;  %v585_v30 = vpop.f32.mrb[9].mxu0 }
  0xf7   : > { %1632 = vst [vmem:[%s1927_s27 + $0x98] sm:$0xff] %v1552_v24   ;;  %1615 = vst [vmem:[%s1927_s27 + $0x10] sm:$0xff] %v1467_v25   ;;  %v722_v31 = vadd.f32 %v1725_v29, %v1912_v34  ;;  %v586_v32 = vadd.f32 %v1912_v34, %v585_v30  ;;  %v713_v33 = vpop.f32.mrb[9].mxu1  ;;  %v1694_v35 = vpop.f32.mrb[10].mxu0 }
  0xf8   : > { %1631 = vst [vmem:[%s1927_s27 + $0x90] sm:$0xff] %v1547_v27   ;;  %v714_v36 = vadd.f32 %v1912_v34, %v713_v33  ;;  %v597_v37 = vadd.f32 %v1694_v35, %v1912_v34  ;;  %v1726_v38 = vpop.f32.mrb[10].mxu1  ;;  %v588_v39 = vpop.f32.mrb[11].mxu0  ;;  %v818_v43 = vmax.f32 %v594_v28, 0.0 }
  0xf9   : > { %v725_v40 = vadd.f32 %v1726_v38, %v1912_v34  ;;  %v589_v41 = vadd.f32 %v1912_v34, %v588_v39  ;;  %v716_v42 = vpop.f32.mrb[11].mxu1  ;;  %v850_v46 = vmax.f32 %v722_v31, 0.0  ;;  %v816_v47 = vmax.f32 %v586_v32, 0.0 }
  0xfa   : > { %v819_v44 = vmax.f32 %v597_v37, 0.0  ;;  %v717_v45 = vadd.f32 %v1912_v34, %v716_v42  ;;  %v848_v50 = vmax.f32 %v714_v36, 0.0 }
  0xfb   : > { %v851_v48 = vmax.f32 %v725_v40, 0.0  ;;  %v817_v49 = vmax.f32 %v589_v41, 0.0 }
  0xfc   : > { %v1482_v51 = vpack.c.bf16 %v819_v44, %v818_v43  ;;  %v849_v52 = vmax.f32 %v717_v45, 0.0 }
  0xfd   : > { %v1562_v53 = vpack.c.bf16 %v851_v48, %v850_v46  ;;  %v1477_v54 = vpack.c.bf16 %v817_v49, %v816_v47  ;;  %v1697_v55 = vpop.f32.mrb[12].mxu0 }
  0xfe   : > { %1618 = vst [vmem:[%s1927_s27 + $0x28] sm:$0xff] %v1482_v51   ;;  %v1557_v56 = vpack.c.bf16 %v849_v52, %v848_v50  ;;  %v610_v57 = vadd.f32 %v1697_v55, %v1912_v34  ;;  %v1729_v58 = vpop.f32.mrb[12].mxu1  ;;  %v601_v59 = vpop.f32.mrb[13].mxu0 }
  0xff   : > { %1634 = vst [vmem:[%s1927_s27 + $0xa8] sm:$0xff] %v1562_v53   ;;  %1617 = vst [vmem:[%s1927_s27 + $0x20] sm:$0xff] %v1477_v54   ;;  %v738_v60 = vadd.f32 %v1729_v58, %v1912_v34  ;;  %v602_v61 = vadd.f32 %v1912_v34, %v601_v59  ;;  %v729_v62 = vpop.f32.mrb[13].mxu1  ;;  %v1698_v63 = vpop.f32.mrb[14].mxu0 }
 0x100   : > { %1633 = vst [vmem:[%s1927_s27 + $0xa0] sm:$0xff] %v1557_v56   ;;  %v730_v0 = vadd.f32 %v1912_v34, %v729_v62  ;;  %v613_v1 = vadd.f32 %v1698_v63, %v1912_v34  ;;  %v1730_v2 = vpop.f32.mrb[14].mxu1  ;;  %v604_v3 = vpop.f32.mrb[15].mxu0  ;;  %v822_v7 = vmax.f32 %v610_v57, 0.0 }
 0x101   : > { %v741_v4 = vadd.f32 %v1730_v2, %v1912_v34  ;;  %v605_v5 = vadd.f32 %v1912_v34, %v604_v3  ;;  %v732_v6 = vpop.f32.mrb[15].mxu1  ;;  %v854_v10 = vmax.f32 %v738_v60, 0.0  ;;  %v820_v11 = vmax.f32 %v602_v61, 0.0 }
 0x102   : > { %v823_v8 = vmax.f32 %v613_v1, 0.0  ;;  %v733_v9 = vadd.f32 %v1912_v34, %v732_v6  ;;  %v852_v14 = vmax.f32 %v730_v0, 0.0 }
 0x103   : > { %v855_v12 = vmax.f32 %v741_v4, 0.0  ;;  %v821_v13 = vmax.f32 %v605_v5, 0.0 }
 0x104   : > { %v1492_v15 = vpack.c.bf16 %v823_v8, %v822_v7  ;;  %v853_v16 = vmax.f32 %v733_v9, 0.0 }
 0x105   : > { %v1572_v17 = vpack.c.bf16 %v855_v12, %v854_v10  ;;  %v1487_v18 = vpack.c.bf16 %v821_v13, %v820_v11  ;;  %v1701_v19 = vpop.f32.mrb[16].mxu0 }
 0x106   : > { %1620 = vst [vmem:[%s1927_s27 + $0x38] sm:$0xff] %v1492_v15   ;;  %v1567_v20 = vpack.c.bf16 %v853_v16, %v852_v14  ;;  %v626_v21 = vadd.f32 %v1701_v19, %v1912_v34  ;;  %v1733_v22 = vpop.f32.mrb[16].mxu1  ;;  %v617_v23 = vpop.f32.mrb[17].mxu0 }
 0x107   : > { %1636 = vst [vmem:[%s1927_s27 + $0xb8] sm:$0xff] %v1572_v17   ;;  %1619 = vst [vmem:[%s1927_s27 + $0x30] sm:$0xff] %v1487_v18   ;;  %v754_v24 = vadd.f32 %v1733_v22, %v1912_v34  ;;  %v618_v25 = vadd.f32 %v1912_v34, %v617_v23  ;;  %v745_v26 = vpop.f32.mrb[17].mxu1  ;;  %v1702_v27 = vpop.f32.mrb[18].mxu0 }
 0x108   : > { %1635 = vst [vmem:[%s1927_s27 + $0xb0] sm:$0xff] %v1567_v20   ;;  %v746_v28 = vadd.f32 %v1912_v34, %v745_v26  ;;  %v629_v29 = vadd.f32 %v1702_v27, %v1912_v34  ;;  %v1734_v30 = vpop.f32.mrb[18].mxu1  ;;  %v620_v31 = vpop.f32.mrb[19].mxu0  ;;  %v826_v36 = vmax.f32 %v626_v21, 0.0 }
 0x109   : > { %v757_v32 = vadd.f32 %v1734_v30, %v1912_v34  ;;  %v621_v33 = vadd.f32 %v1912_v34, %v620_v31  ;;  %v748_v35 = vpop.f32.mrb[19].mxu1  ;;  %v858_v39 = vmax.f32 %v754_v24, 0.0  ;;  %v824_v40 = vmax.f32 %v618_v25, 0.0 }
 0x10a   : > { %v827_v37 = vmax.f32 %v629_v29, 0.0  ;;  %v749_v38 = vadd.f32 %v1912_v34, %v748_v35  ;;  %v856_v43 = vmax.f32 %v746_v28, 0.0 }
 0x10b   : > { %v859_v41 = vmax.f32 %v757_v32, 0.0  ;;  %v825_v42 = vmax.f32 %v621_v33, 0.0 }
 0x10c   : > { %v1502_v44 = vpack.c.bf16 %v827_v37, %v826_v36  ;;  %v857_v45 = vmax.f32 %v749_v38, 0.0 }
 0x10d   : > { %v1582_v46 = vpack.c.bf16 %v859_v41, %v858_v39  ;;  %v1497_v47 = vpack.c.bf16 %v825_v42, %v824_v40  ;;  %v1705_v48 = vpop.f32.mrb[20].mxu0 }
 0x10e   : > { %1622 = vst [vmem:[%s1927_s27 + $0x48] sm:$0xff] %v1502_v44   ;;  %v1577_v49 = vpack.c.bf16 %v857_v45, %v856_v43  ;;  %v642_v50 = vadd.f32 %v1705_v48, %v1912_v34  ;;  %v1737_v51 = vpop.f32.mrb[20].mxu1  ;;  %v633_v52 = vpop.f32.mrb[21].mxu0 }
 0x10f   : > { %1638 = vst [vmem:[%s1927_s27 + $0xc8] sm:$0xff] %v1582_v46   ;;  %1621 = vst [vmem:[%s1927_s27 + $0x40] sm:$0xff] %v1497_v47   ;;  %v770_v53 = vadd.f32 %v1737_v51, %v1912_v34  ;;  %v634_v54 = vadd.f32 %v1912_v34, %v633_v52  ;;  %v761_v55 = vpop.f32.mrb[21].mxu1  ;;  %v1706_v56 = vpop.f32.mrb[22].mxu0 }
 0x110   : > { %1637 = vst [vmem:[%s1927_s27 + $0xc0] sm:$0xff] %v1577_v49   ;;  %v762_v57 = vadd.f32 %v1912_v34, %v761_v55  ;;  %v645_v58 = vadd.f32 %v1706_v56, %v1912_v34  ;;  %v1738_v59 = vpop.f32.mrb[22].mxu1  ;;  %v636_v60 = vpop.f32.mrb[23].mxu0  ;;  %v830_v0 = vmax.f32 %v642_v50, 0.0 }
 0x111   : > { %v773_v61 = vadd.f32 %v1738_v59, %v1912_v34  ;;  %v637_v62 = vadd.f32 %v1912_v34, %v636_v60  ;;  %v764_v63 = vpop.f32.mrb[23].mxu1  ;;  %v862_v3 = vmax.f32 %v770_v53, 0.0  ;;  %v828_v4 = vmax.f32 %v634_v54, 0.0 }
 0x112   : > { %v831_v1 = vmax.f32 %v645_v58, 0.0  ;;  %v765_v2 = vadd.f32 %v1912_v34, %v764_v63  ;;  %v860_v7 = vmax.f32 %v762_v57, 0.0 }
 0x113   : > { %v863_v5 = vmax.f32 %v773_v61, 0.0  ;;  %v829_v6 = vmax.f32 %v637_v62, 0.0 }
 0x114   : > { %v1512_v8 = vpack.c.bf16 %v831_v1, %v830_v0  ;;  %v861_v9 = vmax.f32 %v765_v2, 0.0 }
 0x115   : > { %v1592_v10 = vpack.c.bf16 %v863_v5, %v862_v3  ;;  %v1507_v11 = vpack.c.bf16 %v829_v6, %v828_v4  ;;  %v1709_v12 = vpop.f32.mrb[24].mxu0 }
 0x116   : > { %1624 = vst [vmem:[%s1927_s27 + $0x58] sm:$0xff] %v1512_v8   ;;  %v1587_v13 = vpack.c.bf16 %v861_v9, %v860_v7  ;;  %v658_v14 = vadd.f32 %v1709_v12, %v1912_v34  ;;  %v1741_v15 = vpop.f32.mrb[24].mxu1  ;;  %v649_v16 = vpop.f32.mrb[25].mxu0 }
 0x117   : > { %1640 = vst [vmem:[%s1927_s27 + $0xd8] sm:$0xff] %v1592_v10   ;;  %1623 = vst [vmem:[%s1927_s27 + $0x50] sm:$0xff] %v1507_v11   ;;  %v786_v17 = vadd.f32 %v1741_v15, %v1912_v34  ;;  %v650_v18 = vadd.f32 %v1912_v34, %v649_v16  ;;  %v777_v19 = vpop.f32.mrb[25].mxu1  ;;  %v1710_v20 = vpop.f32.mrb[26].mxu0 }
 0x118   : > { %1639 = vst [vmem:[%s1927_s27 + $0xd0] sm:$0xff] %v1587_v13   ;;  %v778_v21 = vadd.f32 %v1912_v34, %v777_v19  ;;  %v661_v22 = vadd.f32 %v1710_v20, %v1912_v34  ;;  %v1742_v23 = vpop.f32.mrb[26].mxu1  ;;  %v652_v24 = vpop.f32.mrb[27].mxu0  ;;  %v834_v28 = vmax.f32 %v658_v14, 0.0 }
 0x119   : > { %v789_v25 = vadd.f32 %v1742_v23, %v1912_v34  ;;  %v653_v26 = vadd.f32 %v1912_v34, %v652_v24  ;;  %v780_v27 = vpop.f32.mrb[27].mxu1  ;;  %v866_v31 = vmax.f32 %v786_v17, 0.0  ;;  %v832_v32 = vmax.f32 %v650_v18, 0.0 }
 0x11a   : > { %v835_v29 = vmax.f32 %v661_v22, 0.0  ;;  %v781_v30 = vadd.f32 %v1912_v34, %v780_v27  ;;  %v864_v36 = vmax.f32 %v778_v21, 0.0 }
 0x11b   : > { %v867_v33 = vmax.f32 %v789_v25, 0.0  ;;  %v833_v35 = vmax.f32 %v653_v26, 0.0 }
 0x11c   : > { %v1522_v37 = vpack.c.bf16 %v835_v29, %v834_v28  ;;  %v865_v38 = vmax.f32 %v781_v30, 0.0 }
 0x11d   : > { %v1602_v39 = vpack.c.bf16 %v867_v33, %v866_v31  ;;  %v1517_v40 = vpack.c.bf16 %v833_v35, %v832_v32  ;;  %v1713_v41 = vpop.f32.mrb[28].mxu0 }
 0x11e   : > { %1626 = vst [vmem:[%s1927_s27 + $0x68] sm:$0xff] %v1522_v37   ;;  %v1597_v42 = vpack.c.bf16 %v865_v38, %v864_v36  ;;  %v674_v43 = vadd.f32 %v1713_v41, %v1912_v34  ;;  %v1745_v44 = vpop.f32.mrb[28].mxu1  ;;  %v665_v45 = vpop.f32.mrb[29].mxu0 }
 0x11f   : > { %1642 = vst [vmem:[%s1927_s27 + $0xe8] sm:$0xff] %v1602_v39   ;;  %1625 = vst [vmem:[%s1927_s27 + $0x60] sm:$0xff] %v1517_v40   ;;  %v802_v46 = vadd.f32 %v1745_v44, %v1912_v34  ;;  %v666_v47 = vadd.f32 %v1912_v34, %v665_v45  ;;  %v793_v48 = vpop.f32.mrb[29].mxu1  ;;  %v1714_v49 = vpop.f32.mrb[30].mxu0 }
 0x120   : > { %1641 = vst [vmem:[%s1927_s27 + $0xe0] sm:$0xff] %v1597_v42   ;;  %v794_v50 = vadd.f32 %v1912_v34, %v793_v48  ;;  %v677_v51 = vadd.f32 %v1714_v49, %v1912_v34  ;;  %v1746_v52 = vpop.f32.mrb[30].mxu1  ;;  %v668_v53 = vpop.f32.mrb[31].mxu0  ;;  %v838_v57 = vmax.f32 %v674_v43, 0.0 }
 0x121   : > { %v805_v54 = vadd.f32 %v1746_v52, %v1912_v34  ;;  %v669_v55 = vadd.f32 %v1912_v34, %v668_v53  ;;  %v796_v56 = vpop.f32.mrb[31].mxu1  ;;  %v870_v60 = vmax.f32 %v802_v46, 0.0  ;;  %v836_v61 = vmax.f32 %v666_v47, 0.0 }
 0x122   : > { %v839_v58 = vmax.f32 %v677_v51, 0.0  ;;  %v797_v59 = vadd.f32 %v1912_v34, %v796_v56  ;;  %v868_v0 = vmax.f32 %v794_v50, 0.0 }
 0x123   : > { %v871_v62 = vmax.f32 %v805_v54, 0.0  ;;  %v837_v63 = vmax.f32 %v669_v55, 0.0 }
 0x124   : > { %v1532_v1 = vpack.c.bf16 %v839_v58, %v838_v57  ;;  %v869_v2 = vmax.f32 %v797_v59, 0.0 }
 0x125   : > { %v1612_v3 = vpack.c.bf16 %v871_v62, %v870_v60  ;;  %v1527_v4 = vpack.c.bf16 %v837_v63, %v836_v61 }
 0x126   : > { %1628 = vst [vmem:[%s1927_s27 + $0x78] sm:$0xff] %v1532_v1   ;;  %v1607_v5 = vpack.c.bf16 %v869_v2, %v868_v0 }
 0x127   : > { %1644 = vst [vmem:[%s1927_s27 + $0xf8] sm:$0xff] %v1612_v3   ;;  %1627 = vst [vmem:[%s1927_s27 + $0x70] sm:$0xff] %v1527_v4  }
 0x128   : > { %1643 = vst [vmem:[%s1927_s27 + $0xf0] sm:$0xff] %v1607_v5  }
 0x129 PF: > { %s13_s12 = sadd.s32 1, %s1799_s12  }
 0x12a   : > { %p10_p4 = scmp.ge.s32.totalorder %s13_s12, 5  }
 0x12c   :  { %12 = sbr.rel (!%p10_p4) target bundleno = 1 (0x1), region = 62 }

// kernel: mnist_cnn_forward.7
= control target key start
LH: loop header
LB: loop body
LE: loop exit
PB: predicated region body
PF: predicated region fallthrough
CT: control target
= control target key end

     0   :  { %s836_s1 = inlined_call_operand.vmem [shape: bf16[256,128], index: 1, kind: input, shape index: {}]   ;;  %s837_s0 = inlined_call_operand.vmem [shape: bf16[128,256], index: 0, kind: input, shape index: {}]   ;;  %s838_s2 = inlined_call_operand.vmem [shape: f32[1,128], index: 2, kind: input, shape index: {}]   ;;  %s839_s3 = inlined_call_operand.vmem [shape: bf16[128,128], index: 3, kind: output, shape index: {}]  }
   0x1   :  { %v635_v0 = vld [vmem:[%s836_s1 + $0x40] sm:$0xff]   ;;  %v637_v2 = vld [vmem:[%s836_s1 + $0x48] sm:$0xff]   ;;  %v639_v4 = vld [vmem:[%s836_s1 + $0x50] sm:$0xff]  }
   0x2   :  { %v636_v1 = vld [vmem:[%s836_s1] sm:$0xff]   ;;  %555 = vmatprep.subr.bf16.mxu0 %v635_v0  ;;  %619 = vmatprep.subr.bf16.mxu1 %v635_v0  ;;  %v638_v3 = vld [vmem:[%s836_s1 + $0x8] sm:$0xff]   ;;  %v640_v5 = vld [vmem:[%s836_s1 + $0x10] sm:$0xff]  }
   0x3   :  { %556 = vmatpush3.bf16.msra.mxu0 %v636_v1  ;;  %627 = vmatpush3.bf16.msra.mxu1 %v636_v1  ;;  %v641_v6 = vld [vmem:[%s836_s1 + $0x58] sm:$0xff]   ;;  %v643_v8 = vld [vmem:[%s836_s1 + $0x60] sm:$0xff]   ;;  %v645_v10 = vld [vmem:[%s836_s1 + $0x68] sm:$0xff]  }
   0x4   :  { %557 = vmatprep.subr.bf16.mxu0 %v637_v2  ;;  %620 = vmatprep.subr.bf16.mxu1 %v637_v2  ;;  %v642_v7 = vld [vmem:[%s836_s1 + $0x18] sm:$0xff]   ;;  %v644_v9 = vld [vmem:[%s836_s1 + $0x20] sm:$0xff]   ;;  %v646_v13 = vld [vmem:[%s836_s1 + $0x28] sm:$0xff]  }
   0x5   :  { %v653_v11 = vld [vmem:[%s837_s0 + $0x4] ss:$8 sps:$4 sm:$0xff]   ;;  %v647_v14 = vld [vmem:[%s836_s1 + $0x70] sm:$0xff]   ;;  %v649_v16 = vld [vmem:[%s836_s1 + $0x78] sm:$0xff]  }
   0x6   :  { %v656_v12 = vld [vmem:[%s837_s0 + $0x44] ss:$8 sps:$4 sm:$0xff]   ;;  %278 = vmatprep.mubr.bf16.mxu0 %v653_v11  ;;  %v648_v15 = vld [vmem:[%s836_s1 + $0x30] sm:$0xff]   ;;  %v650_v17 = vld [vmem:[%s836_s1 + $0x38] sm:$0xff]  }
   0x7   :  { %558 = vmatpush3.bf16.msra.mxu0 %v638_v3  ;;  %628 = vmatpush3.bf16.msra.mxu1 %v638_v3  ;;  %v651_v18 = vld [vmem:[%s837_s0] ss:$8 sps:$4 sm:$0xff]   ;;  %v657_v20 = vld [vmem:[%s837_s0 + $0x14] ss:$8 sps:$4 sm:$0xff]   ;;  %v661_v22 = vld [vmem:[%s837_s0 + $0x10] ss:$8 sps:$4 sm:$0xff]  }
   0x8   :  { %559 = vmatprep.subr.bf16.mxu0 %v639_v4  ;;  %621 = vmatprep.subr.bf16.mxu1 %v639_v4  ;;  %v654_v19 = vld [vmem:[%s837_s0 + $0x40] ss:$8 sps:$4 sm:$0xff]   ;;  %v659_v21 = vld [vmem:[%s837_s0 + $0x54] ss:$8 sps:$4 sm:$0xff]   ;;  %v662_v23 = vld [vmem:[%s837_s0 + $0x50] ss:$8 sps:$4 sm:$0xff]  }
   0x9   :  { %310 = vmatprep.mubr.bf16.mxu1 %v656_v12  ;;  %v663_v24 = vld [vmem:[%s837_s0 + $0x24] ss:$8 sps:$4 sm:$0xff]   ;;  %v667_v26 = vld [vmem:[%s837_s0 + $0x20] ss:$8 sps:$4 sm:$0xff]   ;;  %v669_v28 = vld [vmem:[%s837_s0 + $0x34] ss:$8 sps:$4 sm:$0xff]  }
   0xa   :  { %v665_v25 = vld [vmem:[%s837_s0 + $0x64] ss:$8 sps:$4 sm:$0xff]   ;;  %v668_v27 = vld [vmem:[%s837_s0 + $0x60] ss:$8 sps:$4 sm:$0xff]   ;;  %v671_v29 = vld [vmem:[%s837_s0 + $0x74] ss:$8 sps:$4 sm:$0xff]  }
   0xb   :  { %560 = vmatpush3.bf16.msra.mxu0 %v640_v5  ;;  %629 = vmatpush3.bf16.msra.mxu1 %v640_v5  ;;  %v673_v30 = vld [vmem:[%s837_s0 + $0x30] ss:$8 sps:$4 sm:$0xff]   ;;  %v794_v34 = vld [vmem:[%s838_s2] ss:$0 sm:$0xff] }
   0xc   :  { %561 = vmatprep.subr.bf16.mxu0 %v641_v6  ;;  %622 = vmatprep.subr.bf16.mxu1 %v641_v6  ;;  %v674_v31 = vld [vmem:[%s837_s0 + $0x70] ss:$8 sps:$4 sm:$0xff]  }
   0xf   :  { %562 = vmatpush3.bf16.msra.mxu0 %v642_v7  ;;  %630 = vmatpush3.bf16.msra.mxu1 %v642_v7 }
  0x10   :  { %563 = vmatprep.subr.bf16.mxu0 %v643_v8  ;;  %623 = vmatprep.subr.bf16.mxu1 %v643_v8 }
  0x13   :  { %564 = vmatpush3.bf16.msra.mxu0 %v644_v9  ;;  %631 = vmatpush3.bf16.msra.mxu1 %v644_v9 }
  0x14   :  { %565 = vmatprep.subr.bf16.mxu0 %v645_v10  ;;  %624 = vmatprep.subr.bf16.mxu1 %v645_v10 }
  0x17   :  { %566 = vmatpush3.bf16.msra.mxu0 %v646_v13  ;;  %632 = vmatpush3.bf16.msra.mxu1 %v646_v13 }
  0x18   :  { %567 = vmatprep.subr.bf16.mxu0 %v647_v14  ;;  %625 = vmatprep.subr.bf16.mxu1 %v647_v14 }
  0x1b   :  { %568 = vmatpush3.bf16.msra.mxu0 %v648_v15  ;;  %633 = vmatpush3.bf16.msra.mxu1 %v648_v15 }
  0x1c   :  { %569 = vmatprep.subr.bf16.mxu0 %v649_v16  ;;  %626 = vmatprep.subr.bf16.mxu1 %v649_v16 }
  0x1f   :  { %570 = vmatpush3.bf16.msra.mxu0 %v650_v17  ;;  %634 = vmatpush3.bf16.msra.mxu1 %v650_v17 }
  0x22   :  { %279 = vmatmul.mubr.bf16.vlgmr.msra.gmra.mrb[0].mxu0 %v651_v18  ;;  %311 = vmatmul.mubr.bf16.vlgmr.msra.gmra.mrb[0].mxu1 %v654_v19 }
  0x23   :  { %286 = vmatprep.mubr.bf16.mxu0 %v657_v20  ;;  %318 = vmatprep.mubr.bf16.mxu1 %v659_v21 }
  0x2a   :  { %287 = vmatmul.mubr.bf16.gmra.mrb[4].mxu0 %v661_v22  ;;  %319 = vmatmul.mubr.bf16.gmra.mrb[4].mxu1 %v662_v23 }
  0x2b   :  { %294 = vmatprep.mubr.bf16.mxu0 %v663_v24  ;;  %326 = vmatprep.mubr.bf16.mxu1 %v665_v25 }
  0x32   :  { %295 = vmatmul.mubr.bf16.gmra.mrb[8].mxu0 %v667_v26  ;;  %327 = vmatmul.mubr.bf16.gmra.mrb[8].mxu1 %v668_v27 }
  0x33   :  { %302 = vmatprep.mubr.bf16.mxu0 %v669_v28  ;;  %334 = vmatprep.mubr.bf16.mxu1 %v671_v29 }
  0x3a   :  { %303 = vmatmul.mubr.bf16.gmra.mrb[12].mxu0 %v673_v30  ;;  %335 = vmatmul.mubr.bf16.gmra.mrb[12].mxu1 %v674_v31 }
  0xf5   :  { %v571_v32 = vpop.f32.mrb[0].mxu0  ;;  %v595_v33 = vpop.f32.mrb[0].mxu1 }
  0xf6   :  { %v572_v35 = vpop.f32.mrb[1].mxu0  ;;  %v596_v36 = vpop.f32.mrb[1].mxu1 }
  0xf7   :  { %v573_v37 = vadd.f32 %v572_v35, %v571_v32  ;;  %v597_v38 = vadd.f32 %v596_v36, %v595_v33  ;;  %v574_v39 = vpop.f32.mrb[2].mxu0  ;;  %v598_v40 = vpop.f32.mrb[2].mxu1 }
  0xf8   :  { %v575_v41 = vpop.f32.mrb[3].mxu0  ;;  %v599_v42 = vpop.f32.mrb[3].mxu1 }
  0xf9   :  { %v281_v43 = vadd.f32 %v573_v37, %v794_v34  ;;  %v313_v44 = vadd.f32 %v597_v38, %v794_v34  ;;  %v576_v45 = vadd.f32 %v575_v41, %v574_v39  ;;  %v600_v46 = vadd.f32 %v599_v42, %v598_v40 }
  0xfb   :  { %v284_v47 = vadd.f32 %v576_v45, %v794_v34  ;;  %v316_v48 = vadd.f32 %v600_v46, %v794_v34  ;;  %v343_v49 = vmax.f32 %v281_v43, 0.0  ;;  %v351_v50 = vmax.f32 %v313_v44, 0.0 }
  0xfd   :  { %v344_v51 = vmax.f32 %v284_v47, 0.0  ;;  %v352_v52 = vmax.f32 %v316_v48, 0.0  ;;  %v577_v53 = vpop.f32.mrb[4].mxu0  ;;  %v601_v54 = vpop.f32.mrb[4].mxu1 }
  0xfe   :  { %v578_v55 = vpop.f32.mrb[5].mxu0  ;;  %v602_v56 = vpop.f32.mrb[5].mxu1 }
  0xff   :  { %v511_v57 = vpack.c.bf16 %v344_v51, %v343_v49  ;;  %v531_v58 = vpack.c.bf16 %v352_v52, %v351_v50  ;;  %v579_v59 = vadd.f32 %v578_v55, %v577_v53  ;;  %v603_v60 = vadd.f32 %v602_v56, %v601_v54  ;;  %v580_v61 = vpop.f32.mrb[6].mxu0  ;;  %v604_v62 = vpop.f32.mrb[6].mxu1 }
 0x100   :  { %v581_v63 = vpop.f32.mrb[7].mxu0  ;;  %v605_v0 = vpop.f32.mrb[7].mxu1 }
 0x101   :  { %512 = vst [vmem:[%s839_s3] sm:$0xff] %v511_v57   ;;  %551 = vst [vmem:[%s839_s3 + $0x20] sm:$0xff] %v531_v58   ;;  %v289_v1 = vadd.f32 %v579_v59, %v794_v34  ;;  %v321_v2 = vadd.f32 %v603_v60, %v794_v34  ;;  %v582_v3 = vadd.f32 %v581_v63, %v580_v61 }
 0x102   :  { %v606_v4 = vadd.f32 %v605_v0, %v604_v62 }
 0x103   :  { %v292_v5 = vadd.f32 %v582_v3, %v794_v34  ;;  %v345_v7 = vmax.f32 %v289_v1, 0.0  ;;  %v353_v8 = vmax.f32 %v321_v2, 0.0 }
 0x104   :  { %v324_v6 = vadd.f32 %v606_v4, %v794_v34 }
 0x105   :  { %v346_v9 = vmax.f32 %v292_v5, 0.0  ;;  %v583_v11 = vpop.f32.mrb[8].mxu0  ;;  %v607_v12 = vpop.f32.mrb[8].mxu1 }
 0x106   :  { %v354_v10 = vmax.f32 %v324_v6, 0.0  ;;  %v584_v13 = vpop.f32.mrb[9].mxu0  ;;  %v608_v14 = vpop.f32.mrb[9].mxu1 }
 0x107   :  { %v516_v15 = vpack.c.bf16 %v346_v9, %v345_v7  ;;  %v585_v17 = vadd.f32 %v584_v13, %v583_v11  ;;  %v609_v18 = vadd.f32 %v608_v14, %v607_v12  ;;  %v586_v19 = vpop.f32.mrb[10].mxu0  ;;  %v610_v20 = vpop.f32.mrb[10].mxu1 }
 0x108   :  { %v536_v16 = vpack.c.bf16 %v354_v10, %v353_v8  ;;  %v587_v21 = vpop.f32.mrb[11].mxu0  ;;  %v611_v22 = vpop.f32.mrb[11].mxu1 }
 0x109   :  { %548 = vst [vmem:[%s839_s3 + $0x8] sm:$0xff] %v516_v15   ;;  %v297_v23 = vadd.f32 %v585_v17, %v794_v34  ;;  %v329_v24 = vadd.f32 %v609_v18, %v794_v34  ;;  %v588_v25 = vadd.f32 %v587_v21, %v586_v19  ;;  %v612_v26 = vadd.f32 %v611_v22, %v610_v20 }
 0x10a   :  { %552 = vst [vmem:[%s839_s3 + $0x28] sm:$0xff] %v536_v16  }
 0x10b   :  { %v300_v27 = vadd.f32 %v588_v25, %v794_v34  ;;  %v332_v28 = vadd.f32 %v612_v26, %v794_v34  ;;  %v347_v29 = vmax.f32 %v297_v23, 0.0  ;;  %v355_v30 = vmax.f32 %v329_v24, 0.0 }
 0x10d   :  { %v348_v31 = vmax.f32 %v300_v27, 0.0  ;;  %v356_v32 = vmax.f32 %v332_v28, 0.0  ;;  %v589_v33 = vpop.f32.mrb[12].mxu0  ;;  %v613_v35 = vpop.f32.mrb[12].mxu1 }
 0x10e   :  { %v590_v36 = vpop.f32.mrb[13].mxu0  ;;  %v614_v37 = vpop.f32.mrb[13].mxu1 }
 0x10f   :  { %v521_v38 = vpack.c.bf16 %v348_v31, %v347_v29  ;;  %v541_v39 = vpack.c.bf16 %v356_v32, %v355_v30  ;;  %v591_v40 = vadd.f32 %v590_v36, %v589_v33  ;;  %v615_v41 = vadd.f32 %v614_v37, %v613_v35  ;;  %v592_v42 = vpop.f32.mrb[14].mxu0  ;;  %v616_v43 = vpop.f32.mrb[14].mxu1 }
 0x110   :  { %v593_v44 = vpop.f32.mrb[15].mxu0  ;;  %v617_v45 = vpop.f32.mrb[15].mxu1 }
 0x111   :  { %549 = vst [vmem:[%s839_s3 + $0x10] sm:$0xff] %v521_v38   ;;  %553 = vst [vmem:[%s839_s3 + $0x30] sm:$0xff] %v541_v39   ;;  %v305_v46 = vadd.f32 %v591_v40, %v794_v34  ;;  %v337_v47 = vadd.f32 %v615_v41, %v794_v34  ;;  %v594_v48 = vadd.f32 %v593_v44, %v592_v42 }
 0x112   :  { %v618_v49 = vadd.f32 %v617_v45, %v616_v43 }
 0x113   :  { %v308_v50 = vadd.f32 %v594_v48, %v794_v34  ;;  %v349_v52 = vmax.f32 %v305_v46, 0.0  ;;  %v357_v53 = vmax.f32 %v337_v47, 0.0 }
 0x114   :  { %v340_v51 = vadd.f32 %v618_v49, %v794_v34 }
 0x115   :  { %v350_v54 = vmax.f32 %v308_v50, 0.0 }
 0x116   :  { %v358_v55 = vmax.f32 %v340_v51, 0.0 }
 0x117   :  { %v526_v56 = vpack.c.bf16 %v350_v54, %v349_v52 }
 0x118   :  { %v546_v57 = vpack.c.bf16 %v358_v55, %v357_v53 }
 0x119   :  { %550 = vst [vmem:[%s839_s3 + $0x18] sm:$0xff] %v526_v56  }
 0x11a   :  { %554 = vst [vmem:[%s839_s3 + $0x38] sm:$0xff] %v546_v57  }

// kernel: mnist_cnn_forward.8
= control target key start
LH: loop header
LB: loop body
LE: loop exit
PB: predicated region body
PF: predicated region fallthrough
CT: control target
= control target key end

     0   :  { %vm25_vm0 = vcmask 1041408   ;;  %vm26_vm1 = vcmask 1043458   ;;  %s247_s0 = inlined_call_operand.vmem [shape: bf16[8,2,4,256], index: 0, kind: input, shape index: {}]   ;;  %s248_s1 = inlined_call_operand.vmem [shape: bf16[8,4,128], index: 1, kind: output, shape index: {}]  }
   0x1   :  { %v9_v0 = vld [vmem:[%s247_s0] sm:$0xf]  ;;  %v10_v1 = vld [vmem:[%s247_s0 + $0x4] sm:$0xf]  ;;  %vm145_vm2 = vmor %vm26_vm1, %vm25_vm0 }
   0x2   :  { %v30_v3 = vsel %vm145_vm2, %v9_v0, 4286644096  ;;  %v33_v4 = vsel %vm145_vm2, %v10_v1, 4286644096  ;;  %v11_v5 = vld [vmem:[%s247_s0 + $0x8] sm:$0xf] }
   0x3   :  { %v35_v6 = vmax.bf16 %v33_v4, %v30_v3  ;;  %v12_v7 = vld [vmem:[%s247_s0 + $0xc] sm:$0xf]  ;;  %v37_v8 = vsel %vm145_vm2, %v11_v5, 4286644096  ;;  %v13_v9 = vld [vmem:[%s247_s0 + $0x10] sm:$0xf] }
   0x4   :  { %v40_v10 = vsel %vm145_vm2, %v12_v7, 4286644096  ;;  %v14_v11 = vld [vmem:[%s247_s0 + $0x14] sm:$0xf]  ;;  %v44_v12 = vsel %vm145_vm2, %v13_v9, 4286644096 }
   0x5   :  { %v93_v13 = vrot.slane %v35_v6, 2  ;;  %v42_v14 = vmax.bf16 %v40_v10, %v37_v8  ;;  %v47_v15 = vsel %vm145_vm2, %v14_v11, 4286644096  ;;  %v15_v16 = vld [vmem:[%s247_s0 + $0x18] sm:$0xf] }
   0x6   :  { %v49_v17 = vmax.bf16 %v47_v15, %v44_v12  ;;  %v16_v18 = vld [vmem:[%s247_s0 + $0x1c] sm:$0xf]  ;;  %v51_v19 = vsel %vm145_vm2, %v15_v16, 4286644096  ;;  %v17_v20 = vld [vmem:[%s247_s0 + $0x20] sm:$0xf] }
   0x7   :  { %v109_v21 = vmax.bf16 %v93_v13, %v35_v6  ;;  %v94_v22 = vrot.slane %v42_v14, 2  ;;  %v54_v23 = vsel %vm145_vm2, %v16_v18, 4286644096  ;;  %v18_v24 = vld [vmem:[%s247_s0 + $0x24] sm:$0xf] }
   0x8   :  { %v95_v25 = vrot.slane %v49_v17, 2  ;;  %v56_v26 = vmax.bf16 %v54_v23, %v51_v19  ;;  %v58_v27 = vsel %vm145_vm2, %v17_v20, 4286644096  ;;  %v61_v28 = vsel %vm145_vm2, %v18_v24, 4286644096 }
   0x9   :  { %117 = vst [vmem:[%s248_s1] sm:$0x3] %v109_v21  ;;  %v110_v29 = vmax.bf16 %v94_v22, %v42_v14  ;;  %v63_v30 = vmax.bf16 %v61_v28, %v58_v27  ;;  %v19_v31 = vld [vmem:[%s247_s0 + $0x28] sm:$0xf]  ;;  %v20_v32 = vld [vmem:[%s247_s0 + $0x2c] sm:$0xf] }
   0xa   :  { %v21_v33 = vld [vmem:[%s247_s0 + $0x30] sm:$0xf]  ;;  %v111_v34 = vmax.bf16 %v95_v25, %v49_v17  ;;  %v96_v35 = vrot.slane %v56_v26, 2  ;;  %v65_v36 = vsel %vm145_vm2, %v19_v31, 4286644096 }
   0xb   :  { %v68_v37 = vsel %vm145_vm2, %v20_v32, 4286644096  ;;  %118 = vst [vmem:[%s248_s1 + $0x2] sm:$0x3] %v110_v29  ;;  %v97_v38 = vrot.slane %v63_v30, 2 }
   0xc   :  { %v70_v39 = vmax.bf16 %v68_v37, %v65_v36  ;;  %v22_v40 = vld [vmem:[%s247_s0 + $0x34] sm:$0xf]  ;;  %v72_v41 = vsel %vm145_vm2, %v21_v33, 4286644096  ;;  %119 = vst [vmem:[%s248_s1 + $0x4] sm:$0x3] %v111_v34  ;;  %v112_v42 = vmax.bf16 %v96_v35, %v56_v26 }
   0xd   :  { %v75_v43 = vsel %vm145_vm2, %v22_v40, 4286644096  ;;  %v23_v44 = vld [vmem:[%s247_s0 + $0x38] sm:$0xf]  ;;  %v24_v45 = vld [vmem:[%s247_s0 + $0x3c] sm:$0xf]  ;;  %v113_v46 = vmax.bf16 %v97_v38, %v63_v30 }
   0xe   :  { %v98_v47 = vrot.slane %v70_v39, 2  ;;  %v77_v48 = vmax.bf16 %v75_v43, %v72_v41  ;;  %v79_v49 = vsel %vm145_vm2, %v23_v44, 4286644096  ;;  %120 = vst [vmem:[%s248_s1 + $0x6] sm:$0x3] %v112_v42 }
   0xf   :  { %v82_v50 = vsel %vm145_vm2, %v24_v45, 4286644096  ;;  %121 = vst [vmem:[%s248_s1 + $0x8] sm:$0x3] %v113_v46 }
  0x10   :  { %v114_v51 = vmax.bf16 %v98_v47, %v70_v39  ;;  %v99_v52 = vrot.slane %v77_v48, 2  ;;  %v84_v53 = vmax.bf16 %v82_v50, %v79_v49 }
  0x12   :  { %122 = vst [vmem:[%s248_s1 + $0xa] sm:$0x3] %v114_v51  ;;  %v115_v54 = vmax.bf16 %v99_v52, %v77_v48  ;;  %v100_v55 = vrot.slane %v84_v53, 2 }
  0x14   :  { %123 = vst [vmem:[%s248_s1 + $0xc] sm:$0x3] %v115_v54  ;;  %v116_v56 = vmax.bf16 %v100_v55, %v84_v53 }
  0x16   :  { %124 = vst [vmem:[%s248_s1 + $0xe] sm:$0x3] %v116_v56 }

// kernel: mnist_cnn_forward.9
= control target key start
LH: loop header
LB: loop body
LE: loop exit
PB: predicated region body
PF: predicated region fallthrough
CT: control target
= control target key end

     0   :  { %vm2082_vm0 = vmmov 0   ;;  %s2554_s1 = inlined_call_operand.vmem [shape: bf16[2048,128], index: 1, kind: input, shape index: {}]   ;;  %s2555_s0 = inlined_call_operand.vmem [shape: bf16[8,2048], index: 0, kind: input, shape index: {}]   ;;  %s2556_s3 = inlined_call_operand.vmem [shape: bf16[128,128], index: 3, kind: input, shape index: {}]   ;;  %s2557_s2 = inlined_call_operand.vmem [shape: f32[1,128], index: 2, kind: input, shape index: {}]   ;;  %s2558_s4 = inlined_call_operand.vmem [shape: f32[1,128], index: 4, kind: input, shape index: {}]   ;;  %s2559_s5 = inlined_call_operand.vmem [shape: f32[8,128], index: 5, kind: output, shape index: {}]  }
   0x1   :  { %v1925_v0 = vld [vmem:[%s2554_s1 + $0x40] sm:$0xff]   ;;  %v1929_v4 = vld [vmem:[%s2554_s1 + $0x48] sm:$0xff]   ;;  %v1933_v8 = vld [vmem:[%s2554_s1 + $0x50] sm:$0xff]  }
   0x2   :  { %v1926_v1 = vld [vmem:[%s2554_s1 + $0xc0] sm:$0xff]   ;;  %1718 = vmatprep.subr.bf16.mxu0 %v1925_v0  ;;  %v1930_v5 = vld [vmem:[%s2554_s1 + $0xc8] sm:$0xff]   ;;  %v1934_v9 = vld [vmem:[%s2554_s1 + $0xd0] sm:$0xff]  }
   0x3   :  { %v1927_v2 = vld [vmem:[%s2554_s1] sm:$0xff]   ;;  %1740 = vmatprep.subr.bf16.mxu1 %v1926_v1  ;;  %v1931_v6 = vld [vmem:[%s2554_s1 + $0x8] sm:$0xff]   ;;  %v1935_v10 = vld [vmem:[%s2554_s1 + $0x10] sm:$0xff]  }
   0x4   :  { %v1928_v3 = vld [vmem:[%s2554_s1 + $0x80] sm:$0xff]   ;;  %1719 = vmatpush3.bf16.msra.mxu0 %v1927_v2  ;;  %v1932_v7 = vld [vmem:[%s2554_s1 + $0x88] sm:$0xff]   ;;  %v1936_v11 = vld [vmem:[%s2554_s1 + $0x90] sm:$0xff]  }
   0x5   :  { %1741 = vmatpush3.bf16.msra.mxu1 %v1928_v3  ;;  %1720 = vmatprep.subr.bf16.mxu0 %v1929_v4  ;;  %v1937_v12 = vld [vmem:[%s2554_s1 + $0x58] sm:$0xff]   ;;  %v1941_v16 = vld [vmem:[%s2554_s1 + $0x60] sm:$0xff]   ;;  %v1945_v20 = vld [vmem:[%s2554_s1 + $0x68] sm:$0xff]  }
   0x6   :  { %1742 = vmatprep.subr.bf16.mxu1 %v1930_v5  ;;  %v1938_v13 = vld [vmem:[%s2554_s1 + $0xd8] sm:$0xff]   ;;  %v1942_v17 = vld [vmem:[%s2554_s1 + $0xe0] sm:$0xff]   ;;  %v1946_v21 = vld [vmem:[%s2554_s1 + $0xe8] sm:$0xff]  }
   0x7   :  { %v1939_v14 = vld [vmem:[%s2554_s1 + $0x18] sm:$0xff]   ;;  %v1943_v18 = vld [vmem:[%s2554_s1 + $0x20] sm:$0xff]   ;;  %v1947_v22 = vld [vmem:[%s2554_s1 + $0x28] sm:$0xff]  }
   0x8   :  { %1721 = vmatpush3.bf16.msra.mxu0 %v1931_v6  ;;  %v1940_v15 = vld [vmem:[%s2554_s1 + $0x98] sm:$0xff]   ;;  %v1944_v19 = vld [vmem:[%s2554_s1 + $0xa0] sm:$0xff]   ;;  %v1948_v23 = vld [vmem:[%s2554_s1 + $0xa8] sm:$0xff]  }
   0x9   :  { %1743 = vmatpush3.bf16.msra.mxu1 %v1932_v7  ;;  %1722 = vmatprep.subr.bf16.mxu0 %v1933_v8  ;;  %v1949_v24 = vld [vmem:[%s2554_s1 + $0x70] sm:$0xff]   ;;  %v1953_v28 = vld [vmem:[%s2554_s1 + $0x78] sm:$0xff]   ;;  %v21_v32 = vld [vmem:[%s2555_s0] sm:$0xff] }
   0xa   :  { %1744 = vmatprep.subr.bf16.mxu1 %v1934_v9  ;;  %v1950_v25 = vld [vmem:[%s2554_s1 + $0xf0] sm:$0xff]   ;;  %v1954_v29 = vld [vmem:[%s2554_s1 + $0xf8] sm:$0xff]   ;;  %v22_v33 = vld [vmem:[%s2555_s0 + $0x8] sm:$0xff]  ;;  %v1565_v34 = vcombine.low %v21_v32, %v21_v32  ;;  %v1566_v35 = vcombine.high %v21_v32, %v21_v32 }
   0xb   :  { %v1951_v26 = vld [vmem:[%s2554_s1 + $0x30] sm:$0xff]   ;;  %v1955_v30 = vld [vmem:[%s2554_s1 + $0x38] sm:$0xff]   ;;  %v1567_v36 = vcombine.low %v22_v33, %v22_v33  ;;  %v1568_v37 = vcombine.high %v22_v33, %v22_v33  ;;  %v1961_v38 = vld [vmem:[%s2554_s1 + $0x140] sm:$0xff]  }
   0xc   :  { %1723 = vmatpush3.bf16.msra.mxu0 %v1935_v10  ;;  %v1952_v27 = vld [vmem:[%s2554_s1 + $0xb0] sm:$0xff]   ;;  %v1956_v31 = vld [vmem:[%s2554_s1 + $0xb8] sm:$0xff]   ;;  %v1962_v39 = vld [vmem:[%s2554_s1 + $0x1c0] sm:$0xff]   ;;  %1148 = vmatprep.mubr.bf16.mxu0 %v1566_v35 }
   0xd   :  { %1745 = vmatpush3.bf16.msra.mxu1 %v1936_v11  ;;  %1724 = vmatprep.subr.bf16.mxu0 %v1937_v12  ;;  %v1963_v40 = vld [vmem:[%s2554_s1 + $0x100] sm:$0xff]   ;;  %v1965_v42 = vld [vmem:[%s2554_s1 + $0x148] sm:$0xff]   ;;  %v1969_v46 = vld [vmem:[%s2554_s1 + $0x150] sm:$0xff]  }
   0xe   :  { %1746 = vmatprep.subr.bf16.mxu1 %v1938_v13  ;;  %1188 = vmatprep.mubr.bf16.mxu1 %v1568_v37  ;;  %v1964_v41 = vld [vmem:[%s2554_s1 + $0x180] sm:$0xff]   ;;  %v1966_v43 = vld [vmem:[%s2554_s1 + $0x1c8] sm:$0xff]   ;;  %v1970_v47 = vld [vmem:[%s2554_s1 + $0x1d0] sm:$0xff]  }
   0xf   :  { %v1967_v44 = vld [vmem:[%s2554_s1 + $0x108] sm:$0xff]   ;;  %v1971_v48 = vld [vmem:[%s2554_s1 + $0x110] sm:$0xff]   ;;  %v1973_v50 = vld [vmem:[%s2554_s1 + $0x158] sm:$0xff]  }
  0x10   :  { %1725 = vmatpush3.bf16.msra.mxu0 %v1939_v14  ;;  %v1968_v45 = vld [vmem:[%s2554_s1 + $0x188] sm:$0xff]   ;;  %v1972_v49 = vld [vmem:[%s2554_s1 + $0x190] sm:$0xff]   ;;  %v1974_v51 = vld [vmem:[%s2554_s1 + $0x1d8] sm:$0xff]  }
  0x11   :  { %1747 = vmatpush3.bf16.msra.mxu1 %v1940_v15  ;;  %1726 = vmatprep.subr.bf16.mxu0 %v1941_v16  ;;  %v1975_v52 = vld [vmem:[%s2554_s1 + $0x118] sm:$0xff]   ;;  %v1977_v54 = vld [vmem:[%s2554_s1 + $0x160] sm:$0xff]   ;;  %v1981_v58 = vld [vmem:[%s2554_s1 + $0x168] sm:$0xff]  }
  0x12   :  { %1748 = vmatprep.subr.bf16.mxu1 %v1942_v17  ;;  %v1976_v53 = vld [vmem:[%s2554_s1 + $0x198] sm:$0xff]   ;;  %v1978_v55 = vld [vmem:[%s2554_s1 + $0x1e0] sm:$0xff]   ;;  %v1982_v59 = vld [vmem:[%s2554_s1 + $0x1e8] sm:$0xff]  }
  0x13   :  { %v1979_v56 = vld [vmem:[%s2554_s1 + $0x120] sm:$0xff]   ;;  %v1983_v60 = vld [vmem:[%s2554_s1 + $0x128] sm:$0xff]   ;;  %v1985_v62 = vld [vmem:[%s2554_s1 + $0x170] sm:$0xff]  }
  0x14   :  { %1727 = vmatpush3.bf16.msra.mxu0 %v1943_v18  ;;  %v1980_v57 = vld [vmem:[%s2554_s1 + $0x1a0] sm:$0xff]   ;;  %v1984_v61 = vld [vmem:[%s2554_s1 + $0x1a8] sm:$0xff]   ;;  %v1986_v63 = vld [vmem:[%s2554_s1 + $0x1f0] sm:$0xff]  }
  0x15   :  { %1749 = vmatpush3.bf16.msra.mxu1 %v1944_v19  ;;  %1728 = vmatprep.subr.bf16.mxu0 %v1945_v20  ;;  %v1987_v0 = vld [vmem:[%s2554_s1 + $0x130] sm:$0xff]   ;;  %v1989_v2 = vld [vmem:[%s2554_s1 + $0x178] sm:$0xff]   ;;  %v1997_v12 = vld [vmem:[%s2554_s1 + $0x240] sm:$0xff]  }
  0x16   :  { %1750 = vmatprep.subr.bf16.mxu1 %v1946_v21  ;;  %v1988_v1 = vld [vmem:[%s2554_s1 + $0x1b0] sm:$0xff]   ;;  %v1990_v3 = vld [vmem:[%s2554_s1 + $0x1f8] sm:$0xff]   ;;  %v1998_v13 = vld [vmem:[%s2554_s1 + $0x2c0] sm:$0xff]  }
  0x17   :  { %v1991_v4 = vld [vmem:[%s2554_s1 + $0x138] sm:$0xff]   ;;  %v23_v6 = vld [vmem:[%s2555_s0 + $0x10] sm:$0xff]  ;;  %v1999_v14 = vld [vmem:[%s2554_s1 + $0x200] sm:$0xff]  }
  0x18   :  { %1729 = vmatpush3.bf16.msra.mxu0 %v1947_v22  ;;  %v1992_v5 = vld [vmem:[%s2554_s1 + $0x1b8] sm:$0xff]   ;;  %v1569_v7 = vcombine.low %v23_v6, %v23_v6  ;;  %v1570_v8 = vcombine.high %v23_v6, %v23_v6  ;;  %v2000_v15 = vld [vmem:[%s2554_s1 + $0x280] sm:$0xff]   ;;  %v2001_v16 = vld [vmem:[%s2554_s1 + $0x248] sm:$0xff]  }
  0x19   :  { %1751 = vmatpush3.bf16.msra.mxu1 %v1948_v23  ;;  %1730 = vmatprep.subr.bf16.mxu0 %v1949_v24  ;;  %v24_v9 = vld [vmem:[%s2555_s0 + $0x18] sm:$0xff]  ;;  %v2002_v17 = vld [vmem:[%s2554_s1 + $0x2c8] sm:$0xff]   ;;  %v2005_v20 = vld [vmem:[%s2554_s1 + $0x250] sm:$0xff]  }
  0x1a   :  { %1752 = vmatprep.subr.bf16.mxu1 %v1950_v25  ;;  %v1571_v10 = vcombine.low %v24_v9, %v24_v9  ;;  %v1572_v11 = vcombine.high %v24_v9, %v24_v9  ;;  %v2003_v18 = vld [vmem:[%s2554_s1 + $0x208] sm:$0xff]   ;;  %v2006_v21 = vld [vmem:[%s2554_s1 + $0x2d0] sm:$0xff]   ;;  %v2009_v24 = vld [vmem:[%s2554_s1 + $0x258] sm:$0xff]  }
  0x1b   :  { %v2004_v19 = vld [vmem:[%s2554_s1 + $0x288] sm:$0xff]   ;;  %v2007_v22 = vld [vmem:[%s2554_s1 + $0x210] sm:$0xff]   ;;  %v2010_v25 = vld [vmem:[%s2554_s1 + $0x2d8] sm:$0xff]  }
  0x1c   :  { %1731 = vmatpush3.bf16.msra.mxu0 %v1951_v26  ;;  %v2008_v23 = vld [vmem:[%s2554_s1 + $0x290] sm:$0xff]   ;;  %v2011_v26 = vld [vmem:[%s2554_s1 + $0x218] sm:$0xff]   ;;  %v2017_v32 = vld [vmem:[%s2554_s1 + $0x268] sm:$0xff]  }
  0x1d   :  { %1753 = vmatpush3.bf16.msra.mxu1 %v1952_v27  ;;  %1732 = vmatprep.subr.bf16.mxu0 %v1953_v28  ;;  %v2012_v27 = vld [vmem:[%s2554_s1 + $0x298] sm:$0xff]   ;;  %v2013_v28 = vld [vmem:[%s2554_s1 + $0x260] sm:$0xff]   ;;  %v2018_v33 = vld [vmem:[%s2554_s1 + $0x2e8] sm:$0xff]  }
  0x1e   :  { %1754 = vmatprep.subr.bf16.mxu1 %v1954_v29  ;;  %v2014_v29 = vld [vmem:[%s2554_s1 + $0x2e0] sm:$0xff]   ;;  %v2020_v35 = vld [vmem:[%s2554_s1 + $0x2a8] sm:$0xff]   ;;  %v2022_v37 = vld [vmem:[%s2554_s1 + $0x2f0] sm:$0xff]  }
  0x1f   :  { %v2053_v6 = vld [vmem:[%s2554_s1 + $0x368] sm:$0xff]  }
  0x20   :  { %1733 = vmatpush3.bf16.msra.mxu0 %v1955_v30  ;;  %v2015_v30 = vld [vmem:[%s2554_s1 + $0x220] sm:$0xff]   ;;  %v2056_v9 = vld [vmem:[%s2554_s1 + $0x3a8] sm:$0xff]  }
  0x21   :  { %1755 = vmatpush3.bf16.msra.mxu1 %v1956_v31  ;;  %1762 = vmatprep.subr.bf16.mxu0 %v1961_v38  ;;  %v2016_v31 = vld [vmem:[%s2554_s1 + $0x2a0] sm:$0xff]   ;;  %v2023_v38 = vld [vmem:[%s2554_s1 + $0x230] sm:$0xff]  }
  0x22   :  { %1784 = vmatprep.subr.bf16.mxu1 %v1962_v39  ;;  %v2024_v39 = vld [vmem:[%s2554_s1 + $0x2b0] sm:$0xff]  }
  0x23   :  { %1149 = vmatmul.mubr.bf16.vlgmr.msra.gmra.mrb[0].mxu0 %v1565_v34  ;;  %v2019_v34 = vld [vmem:[%s2554_s1 + $0x228] sm:$0xff]  }
  0x24   :  { %1189 = vmatmul.mubr.bf16.vlgmr.msra.gmra.mrb[0].mxu1 %v1567_v36  ;;  %1763 = vmatpush3.bf16.msra.mxu0 %v1963_v40  ;;  %v2021_v36 = vld [vmem:[%s2554_s1 + $0x270] sm:$0xff]   ;;  %v2025_v40 = vld [vmem:[%s2554_s1 + $0x278] sm:$0xff]  }
  0x25   :  { %1785 = vmatpush3.bf16.msra.mxu1 %v1964_v41  ;;  %1764 = vmatprep.subr.bf16.mxu0 %v1965_v42  ;;  %v2026_v41 = vld [vmem:[%s2554_s1 + $0x2f8] sm:$0xff]  }
  0x26   :  { %1786 = vmatprep.subr.bf16.mxu1 %v1966_v43  ;;  %1228 = vmatprep.mubr.bf16.mxu0 %v1570_v8  ;;  %v2027_v42 = vld [vmem:[%s2554_s1 + $0x238] sm:$0xff]   ;;  %v2055_v8 = vld [vmem:[%s2554_s1 + $0x328] sm:$0xff]  }
  0x27   :  { %1268 = vmatprep.mubr.bf16.mxu1 %v1572_v11  ;;  %v2028_v43 = vld [vmem:[%s2554_s1 + $0x2b8] sm:$0xff]   ;;  %v2058_v11 = vld [vmem:[%s2554_s1 + $0x3f0] sm:$0xff]  }
  0x28   :  { %1765 = vmatpush3.bf16.msra.mxu0 %v1967_v44  ;;  %v25_v44 = vld [vmem:[%s2555_s0 + $0x20] sm:$0xff] }
  0x29   :  { %1787 = vmatpush3.bf16.msra.mxu1 %v1968_v45  ;;  %1766 = vmatprep.subr.bf16.mxu0 %v1969_v46  ;;  %v26_v45 = vld [vmem:[%s2555_s0 + $0x28] sm:$0xff]  ;;  %v1573_v46 = vcombine.low %v25_v44, %v25_v44 }
  0x2a   :  { %1788 = vmatprep.subr.bf16.mxu1 %v1970_v47  ;;  %v1574_v47 = vcombine.high %v25_v44, %v25_v44 }
  0x2c   :  { %1767 = vmatpush3.bf16.msra.mxu0 %v1971_v48  ;;  %v1575_v48 = vcombine.low %v26_v45, %v26_v45 }
  0x2d   :  { %1789 = vmatpush3.bf16.msra.mxu1 %v1972_v49  ;;  %1768 = vmatprep.subr.bf16.mxu0 %v1973_v50  ;;  %v1576_v49 = vcombine.high %v26_v45, %v26_v45  ;;  %v2033_v50 = vld [vmem:[%s2554_s1 + $0x340] sm:$0xff]  }
  0x2e   :  { %1790 = vmatprep.subr.bf16.mxu1 %v1974_v51  ;;  %v2034_v51 = vld [vmem:[%s2554_s1 + $0x3c0] sm:$0xff]  }
  0x30   :  { %1769 = vmatpush3.bf16.msra.mxu0 %v1975_v52  ;;  %v2035_v52 = vld [vmem:[%s2554_s1 + $0x300] sm:$0xff]  }
  0x31   :  { %1791 = vmatpush3.bf16.msra.mxu1 %v1976_v53  ;;  %1770 = vmatprep.subr.bf16.mxu0 %v1977_v54  ;;  %v2036_v53 = vld [vmem:[%s2554_s1 + $0x380] sm:$0xff]   ;;  %v2037_v54 = vld [vmem:[%s2554_s1 + $0x348] sm:$0xff]  }
  0x32   :  { %1792 = vmatprep.subr.bf16.mxu1 %v1978_v55  ;;  %v2038_v55 = vld [vmem:[%s2554_s1 + $0x3c8] sm:$0xff]  }
  0x34   :  { %1771 = vmatpush3.bf16.msra.mxu0 %v1979_v56  ;;  %v2039_v56 = vld [vmem:[%s2554_s1 + $0x308] sm:$0xff]  }
  0x35   :  { %1793 = vmatpush3.bf16.msra.mxu1 %v1980_v57  ;;  %1772 = vmatprep.subr.bf16.mxu0 %v1981_v58  ;;  %v2040_v57 = vld [vmem:[%s2554_s1 + $0x388] sm:$0xff]   ;;  %v2041_v58 = vld [vmem:[%s2554_s1 + $0x350] sm:$0xff]  }
  0x36   :  { %1794 = vmatprep.subr.bf16.mxu1 %v1982_v59  ;;  %v2042_v59 = vld [vmem:[%s2554_s1 + $0x3d0] sm:$0xff]  }
  0x38   :  { %1773 = vmatpush3.bf16.msra.mxu0 %v1983_v60  ;;  %v2043_v60 = vld [vmem:[%s2554_s1 + $0x310] sm:$0xff]  }
  0x39   :  { %1795 = vmatpush3.bf16.msra.mxu1 %v1984_v61  ;;  %1774 = vmatprep.subr.bf16.mxu0 %v1985_v62  ;;  %v2044_v61 = vld [vmem:[%s2554_s1 + $0x390] sm:$0xff]   ;;  %v2045_v62 = vld [vmem:[%s2554_s1 + $0x358] sm:$0xff]  }
  0x3a   :  { %1796 = vmatprep.subr.bf16.mxu1 %v1986_v63  ;;  %v2046_v63 = vld [vmem:[%s2554_s1 + $0x3d8] sm:$0xff]  }
  0x3c   :  { %1775 = vmatpush3.bf16.msra.mxu0 %v1987_v0  ;;  %v2047_v0 = vld [vmem:[%s2554_s1 + $0x318] sm:$0xff]  }
  0x3d   :  { %1797 = vmatpush3.bf16.msra.mxu1 %v1988_v1  ;;  %1776 = vmatprep.subr.bf16.mxu0 %v1989_v2  ;;  %v2048_v1 = vld [vmem:[%s2554_s1 + $0x398] sm:$0xff]   ;;  %v2049_v2 = vld [vmem:[%s2554_s1 + $0x360] sm:$0xff]  }
  0x3e   :  { %1798 = vmatprep.subr.bf16.mxu1 %v1990_v3  ;;  %v2050_v3 = vld [vmem:[%s2554_s1 + $0x3e0] sm:$0xff]  }
  0x40   :  { %1777 = vmatpush3.bf16.msra.mxu0 %v1991_v4  ;;  %v2051_v4 = vld [vmem:[%s2554_s1 + $0x320] sm:$0xff]  }
  0x41   :  { %1799 = vmatpush3.bf16.msra.mxu1 %v1992_v5  ;;  %1806 = vmatprep.subr.bf16.mxu0 %v1997_v12  ;;  %v2052_v5 = vld [vmem:[%s2554_s1 + $0x3a0] sm:$0xff]   ;;  %v2059_v12 = vld [vmem:[%s2554_s1 + $0x330] sm:$0xff]  }
  0x42   :  { %1828 = vmatprep.subr.bf16.mxu1 %v1998_v13  ;;  %v2060_v13 = vld [vmem:[%s2554_s1 + $0x3b0] sm:$0xff]  }
  0x43   :  { %1229 = vmatmul.mubr.bf16.vlgmr.msra.gmra.mrb[4].mxu0 %v1569_v7  ;;  %v2054_v7 = vld [vmem:[%s2554_s1 + $0x3e8] sm:$0xff]  }
  0x44   :  { %1269 = vmatmul.mubr.bf16.vlgmr.msra.gmra.mrb[4].mxu1 %v1571_v10  ;;  %1807 = vmatpush3.bf16.msra.mxu0 %v1999_v14  ;;  %v2057_v10 = vld [vmem:[%s2554_s1 + $0x370] sm:$0xff]   ;;  %v2061_v14 = vld [vmem:[%s2554_s1 + $0x378] sm:$0xff]  }
  0x45   :  { %1829 = vmatpush3.bf16.msra.mxu1 %v2000_v15  ;;  %1808 = vmatprep.subr.bf16.mxu0 %v2001_v16  ;;  %v2062_v15 = vld [vmem:[%s2554_s1 + $0x3f8] sm:$0xff]  }
  0x46   :  { %1830 = vmatprep.subr.bf16.mxu1 %v2002_v17  ;;  %1308 = vmatprep.mubr.bf16.mxu0 %v1574_v47  ;;  %v2063_v16 = vld [vmem:[%s2554_s1 + $0x338] sm:$0xff]  }
  0x47   :  { %1348 = vmatprep.mubr.bf16.mxu1 %v1576_v49  ;;  %v2064_v17 = vld [vmem:[%s2554_s1 + $0x3b8] sm:$0xff]  }
  0x48   :  { %1809 = vmatpush3.bf16.msra.mxu0 %v2003_v18  ;;  %v27_v18 = vld [vmem:[%s2555_s0 + $0x30] sm:$0xff] }
  0x49   :  { %1831 = vmatpush3.bf16.msra.mxu1 %v2004_v19  ;;  %1810 = vmatprep.subr.bf16.mxu0 %v2005_v20  ;;  %v28_v19 = vld [vmem:[%s2555_s0 + $0x38] sm:$0xff]  ;;  %v1577_v20 = vcombine.low %v27_v18, %v27_v18 }
  0x4a   :  { %1832 = vmatprep.subr.bf16.mxu1 %v2006_v21  ;;  %v1578_v21 = vcombine.high %v27_v18, %v27_v18 }
  0x4c   :  { %1811 = vmatpush3.bf16.msra.mxu0 %v2007_v22  ;;  %v1579_v22 = vcombine.low %v28_v19, %v28_v19 }
  0x4d   :  { %1833 = vmatpush3.bf16.msra.mxu1 %v2008_v23  ;;  %1812 = vmatprep.subr.bf16.mxu0 %v2009_v24  ;;  %v1580_v23 = vcombine.high %v28_v19, %v28_v19  ;;  %v2081_v24 = vmov 0.0  }
  0x4e   :  { %1834 = vmatprep.subr.bf16.mxu1 %v2010_v25  ;;  %v2069_v25 = vld [vmem:[%s2556_s3] sm:$0xff]  }
  0x50   :  { %1813 = vmatpush3.bf16.msra.mxu0 %v2011_v26  ;;  %v2070_v26 = vld [vmem:[%s2556_s3 + $0x8] sm:$0xff]  }
  0x51   :  { %1835 = vmatpush3.bf16.msra.mxu1 %v2012_v27  ;;  %1814 = vmatprep.subr.bf16.mxu0 %v2013_v28  ;;  %v2071_v27 = vld [vmem:[%s2556_s3 + $0x10] sm:$0xff]   ;;  %v2072_v28 = vld [vmem:[%s2556_s3 + $0x18] sm:$0xff]  }
  0x52   :  { %1836 = vmatprep.subr.bf16.mxu1 %v2014_v29  ;;  %v2073_v29 = vld [vmem:[%s2556_s3 + $0x20] sm:$0xff]  }
  0x54   :  { %1815 = vmatpush3.bf16.msra.mxu0 %v2015_v30  ;;  %v2074_v30 = vld [vmem:[%s2556_s3 + $0x28] sm:$0xff]  }
  0x55   :  { %1837 = vmatpush3.bf16.msra.mxu1 %v2016_v31  ;;  %1816 = vmatprep.subr.bf16.mxu0 %v2017_v32  ;;  %v2075_v31 = vld [vmem:[%s2556_s3 + $0x30] sm:$0xff]   ;;  %v2076_v32 = vld [vmem:[%s2556_s3 + $0x38] sm:$0xff]  }
  0x56   :  { %1838 = vmatprep.subr.bf16.mxu1 %v2018_v33 }
  0x58   :  { %1817 = vmatpush3.bf16.msra.mxu0 %v2019_v34 }
  0x59   :  { %1839 = vmatpush3.bf16.msra.mxu1 %v2020_v35  ;;  %1818 = vmatprep.subr.bf16.mxu0 %v2021_v36  ;;  %v1564_v35 = vld [vmem:[%s2557_s2] ss:$0 sm:$0xff] }
  0x5a   :  { %1840 = vmatprep.subr.bf16.mxu1 %v2022_v37 }
  0x5c   :  { %1819 = vmatpush3.bf16.msra.mxu0 %v2023_v38 }
  0x5d   :  { %1841 = vmatpush3.bf16.msra.mxu1 %v2024_v39  ;;  %1820 = vmatprep.subr.bf16.mxu0 %v2025_v40 }
  0x5e   :  { %1842 = vmatprep.subr.bf16.mxu1 %v2026_v41 }
  0x60   :  { %1821 = vmatpush3.bf16.msra.mxu0 %v2027_v42 }
  0x61   :  { %1843 = vmatpush3.bf16.msra.mxu1 %v2028_v43  ;;  %1850 = vmatprep.subr.bf16.mxu0 %v2033_v50 }
  0x62   :  { %1872 = vmatprep.subr.bf16.mxu1 %v2034_v51 }
  0x63   :  { %1309 = vmatmul.mubr.bf16.vlgmr.msra.gmra.mrb[8].mxu0 %v1573_v46 }
  0x64   :  { %1349 = vmatmul.mubr.bf16.vlgmr.msra.gmra.mrb[8].mxu1 %v1575_v48  ;;  %1851 = vmatpush3.bf16.msra.mxu0 %v2035_v52 }
  0x65   :  { %1873 = vmatpush3.bf16.msra.mxu1 %v2036_v53  ;;  %1852 = vmatprep.subr.bf16.mxu0 %v2037_v54 }
  0x66   :  { %1874 = vmatprep.subr.bf16.mxu1 %v2038_v55  ;;  %1388 = vmatprep.mubr.bf16.mxu0 %v1578_v21 }
  0x67   :  { %1428 = vmatprep.mubr.bf16.mxu1 %v1580_v23 }
  0x68   :  { %1853 = vmatpush3.bf16.msra.mxu0 %v2039_v56 }
  0x69   :  { %1875 = vmatpush3.bf16.msra.mxu1 %v2040_v57  ;;  %1854 = vmatprep.subr.bf16.mxu0 %v2041_v58 }
  0x6a   :  { %1876 = vmatprep.subr.bf16.mxu1 %v2042_v59 }
  0x6c   :  { %1855 = vmatpush3.bf16.msra.mxu0 %v2043_v60 }
  0x6d   :  { %1877 = vmatpush3.bf16.msra.mxu1 %v2044_v61  ;;  %1856 = vmatprep.subr.bf16.mxu0 %v2045_v62 }
  0x6e   :  { %1878 = vmatprep.subr.bf16.mxu1 %v2046_v63 }
  0x70   :  { %1857 = vmatpush3.bf16.msra.mxu0 %v2047_v0 }
  0x71   :  { %1879 = vmatpush3.bf16.msra.mxu1 %v2048_v1  ;;  %1858 = vmatprep.subr.bf16.mxu0 %v2049_v2 }
  0x72   :  { %1880 = vmatprep.subr.bf16.mxu1 %v2050_v3 }
  0x74   :  { %1859 = vmatpush3.bf16.msra.mxu0 %v2051_v4 }
  0x75   :  { %1881 = vmatpush3.bf16.msra.mxu1 %v2052_v5  ;;  %1860 = vmatprep.subr.bf16.mxu0 %v2053_v6 }
  0x76   :  { %1882 = vmatprep.subr.bf16.mxu1 %v2054_v7 }
  0x78   :  { %1861 = vmatpush3.bf16.msra.mxu0 %v2055_v8 }
  0x79   :  { %1883 = vmatpush3.bf16.msra.mxu1 %v2056_v9  ;;  %1862 = vmatprep.subr.bf16.mxu0 %v2057_v10 }
  0x7a   :  { %1884 = vmatprep.subr.bf16.mxu1 %v2058_v11 }
  0x7c   :  { %1863 = vmatpush3.bf16.msra.mxu0 %v2059_v12 }
  0x7d   :  { %1885 = vmatpush3.bf16.msra.mxu1 %v2060_v13  ;;  %1864 = vmatprep.subr.bf16.mxu0 %v2061_v14 }
  0x7e   :  { %1886 = vmatprep.subr.bf16.mxu1 %v2062_v15 }
  0x80   :  { %1865 = vmatpush3.bf16.msra.mxu0 %v2063_v16 }
  0x81   :  { %1887 = vmatpush3.bf16.msra.mxu1 %v2064_v17  ;;  %1903 = vmatprep.subr.bf16.mxu0 %v2081_v24 }
  0x83   :  { %1389 = vmatmul.mubr.bf16.vlgmr.msra.gmra.mrb[12].mxu0 %v1577_v20  ;;  %v1709_v20 = vld [vmem:[%s2558_s4] ss:$0 sm:$0xff] }
  0x84   :  { %1429 = vmatmul.mubr.bf16.vlgmr.msra.gmra.mrb[12].mxu1 %v1579_v22  ;;  %1904 = vmatpush3.bf16.msra.mxu0 %v2069_v25 }
  0x85   :  { %1905 = vmatprep.subr.bf16.mxu0 %v2081_v24  ;;  %1919 = vmatprep.mubr.msk.bf16.mxu0 %vm2082_vm0, %v2081_v24 }
  0x88   :  { %1906 = vmatpush3.bf16.msra.mxu0 %v2070_v26 }
  0x89   :  { %1907 = vmatprep.subr.bf16.mxu0 %v2081_v24 }
  0x8c   :  { %1908 = vmatpush3.bf16.msra.mxu0 %v2071_v27 }
  0x8d   :  { %1909 = vmatprep.subr.bf16.mxu0 %v2081_v24 }
  0x90   :  { %1910 = vmatpush3.bf16.msra.mxu0 %v2072_v28 }
  0x91   :  { %1911 = vmatprep.subr.bf16.mxu0 %v2081_v24 }
  0x94   :  { %1912 = vmatpush3.bf16.msra.mxu0 %v2073_v29 }
  0x95   :  { %1913 = vmatprep.subr.bf16.mxu0 %v2081_v24 }
  0x98   :  { %1914 = vmatpush3.bf16.msra.mxu0 %v2074_v30 }
  0x99   :  { %1915 = vmatprep.subr.bf16.mxu0 %v2081_v24 }
  0x9c   :  { %1916 = vmatpush3.bf16.msra.mxu0 %v2075_v31 }
  0x9d   :  { %1917 = vmatprep.subr.bf16.mxu0 %v2081_v24 }
  0xa0   :  { %1918 = vmatpush3.bf16.msra.mxu0 %v2076_v32 }
  0xf6   :  { %v1734_v33 = vpop.f32.mrb[0].mxu0 }
  0xf7   :  { %v1756_v34 = vpop.f32.mrb[0].mxu1  ;;  %v1735_v36 = vpop.f32.mrb[1].mxu0 }
  0xf8   :  { %v1757_v37 = vpop.f32.mrb[1].mxu1  ;;  %v1736_v38 = vadd.f32 %v1735_v36, %v1734_v33  ;;  %v1737_v40 = vpop.f32.mrb[2].mxu0 }
  0xf9   :  { %v1758_v39 = vadd.f32 %v1757_v37, %v1756_v34  ;;  %v1759_v41 = vpop.f32.mrb[2].mxu1  ;;  %v1738_v42 = vpop.f32.mrb[3].mxu0 }
  0xfa   :  { %v1760_v43 = vpop.f32.mrb[3].mxu1  ;;  %v1151_v44 = vadd.f32 %v1736_v38, %v1564_v35 }
  0xfc   :  { %v1191_v45 = vadd.f32 %v1758_v39, %v1151_v44 }
 0x116   :  { %v1778_v46 = vpop.f32.mrb[4].mxu0 }
 0x117   :  { %v1800_v47 = vpop.f32.mrb[4].mxu1  ;;  %v1779_v48 = vpop.f32.mrb[5].mxu0 }
 0x118   :  { %v1801_v49 = vpop.f32.mrb[5].mxu1  ;;  %v1780_v50 = vadd.f32 %v1779_v48, %v1778_v46  ;;  %v1781_v52 = vpop.f32.mrb[6].mxu0 }
 0x119   :  { %v1802_v51 = vadd.f32 %v1801_v49, %v1800_v47  ;;  %v1803_v53 = vpop.f32.mrb[6].mxu1  ;;  %v1782_v54 = vpop.f32.mrb[7].mxu0 }
 0x11a   :  { %v1804_v55 = vpop.f32.mrb[7].mxu1  ;;  %v1231_v56 = vadd.f32 %v1780_v50, %v1191_v45 }
 0x11c   :  { %v1271_v57 = vadd.f32 %v1802_v51, %v1231_v56 }
 0x136   :  { %v1822_v58 = vpop.f32.mrb[8].mxu0 }
 0x137   :  { %v1844_v59 = vpop.f32.mrb[8].mxu1  ;;  %v1823_v60 = vpop.f32.mrb[9].mxu0 }
 0x138   :  { %v1824_v61 = vadd.f32 %v1823_v60, %v1822_v58  ;;  %v1845_v62 = vpop.f32.mrb[9].mxu1  ;;  %v1825_v63 = vpop.f32.mrb[10].mxu0 }
 0x139   :  { %v1846_v0 = vadd.f32 %v1845_v62, %v1844_v59  ;;  %v1847_v1 = vpop.f32.mrb[10].mxu1  ;;  %v1826_v2 = vpop.f32.mrb[11].mxu0 }
 0x13a   :  { %v1311_v3 = vadd.f32 %v1824_v61, %v1271_v57  ;;  %v1848_v4 = vpop.f32.mrb[11].mxu1 }
 0x13c   :  { %v1351_v5 = vadd.f32 %v1846_v0, %v1311_v3 }
 0x156   :  { %v1866_v6 = vpop.f32.mrb[12].mxu0 }
 0x157   :  { %v1888_v7 = vpop.f32.mrb[12].mxu1  ;;  %v1867_v8 = vpop.f32.mrb[13].mxu0 }
 0x158   :  { %v1868_v9 = vadd.f32 %v1867_v8, %v1866_v6  ;;  %v1889_v10 = vpop.f32.mrb[13].mxu1  ;;  %v1869_v11 = vpop.f32.mrb[14].mxu0 }
 0x159   :  { %v1890_v12 = vadd.f32 %v1889_v10, %v1888_v7  ;;  %v1891_v13 = vpop.f32.mrb[14].mxu1  ;;  %v1870_v14 = vpop.f32.mrb[15].mxu0 }
 0x15a   :  { %v1391_v15 = vadd.f32 %v1868_v9, %v1351_v5  ;;  %v1892_v16 = vpop.f32.mrb[15].mxu1 }
 0x15c   :  { %v1431_v17 = vadd.f32 %v1890_v12, %v1391_v15 }
 0x15e   :  { %v1436_v18 = vmax.f32 %v1431_v17, 0.0 }
 0x160   :  { %v1437_v19 = vpack.c.bf16 %v1436_v18, %v1436_v18 }
 0x162   :  { %1920 = vmatmul.mubr.bf16.vlgmr.msra.gmra.mrb[16].mxu0 %v1437_v19 }
 0x235   :  { %v1543_v21 = vpop.f32.mrb[16].mxu0 }
 0x236   :  { %v1544_v22 = vadd.f32 %v1709_v20, %v1543_v21  ;;  %v1921_v23 = vpop.f32.mrb[17].mxu0 }
 0x237   :  { %v1546_v24 = vpop.f32.mrb[18].mxu0 }
 0x238   :  { %1549 = vmax.xlane.f32.xlu0 %v1544_v22  ;;  %v1922_v25 = vpop.f32.mrb[19].mxu0 }
 0x2c5   :  { %v1550_v26 = vpop.xlane.xlu0 %1549 }
 0x2c6   :  { %v1551_v27 = vsub.f32 %v1544_v22, %v1550_v26 }
 0x2c8   :  { %v1552_v28 = vmul.f32 1.442695, %v1551_v27 }
 0x2ca   :  { %2077 = vpow2.f32 %v1552_v28 }
 0x2d4   :  { %v2078_v29 = vpop.eup %2077 }
 0x2d5   :  { %1554 = vadd.xlane.f32.xlu0 %v2078_v29 }
 0x362   :  { %v1555_v30 = vpop.xlane.xlu0 %1554 }
 0x363   :  { %2079 = vlog2.f32 %v1555_v30 }
 0x36d   :  { %v2080_v31 = vpop.eup %2079 }
 0x36e   :  { %v1557_v32 = vmul.f32 0.6931472, %v2080_v31 }
 0x370   :  { %v1558_v33 = vsub.f32 %v1551_v27, %v1557_v32 }
 0x372   :  { %1559 = vst [vmem:[%s2559_s5] sm:$0xff] %v1558_v33 }

</bundles_post_ra>
